<compile_context>
chip_gen: v7x
topology: tpu7x:2x2x1
jax: 0.10.0
libtpu: 0.0.40
codegen_flags: <defaults>
</compile_context>

<pallas_src>
import math
import functools

import jax
import jax.numpy as jnp
from jax.experimental import pallas as pl
from jax.experimental.pallas import tpu as pltpu


def mha_kernel(q_ref, k_ref, v_ref, mask_ref,
               wq_ref, bq_ref, wk_ref, bk_ref, wv_ref, bv_ref,
               wf_ref, bf_ref,
               o_ref,
               *, heads, d_sub, seq, block_batch, approx_softmax):
    S, H, Ds = seq, heads, d_sub
    scale = jnp.float32(1.0 / math.sqrt(Ds))
    cdtype = wq_ref.dtype                       # MXU operand dtype (bf16 or f32)

    # Projections: one (rows, D) x (D, D) matmul each, rows = block_batch * S.
    qp = (jnp.dot(q_ref[...], wq_ref[...], preferred_element_type=jnp.float32)
          + bq_ref[...]) * scale                # fold 1/sqrt(d_sub) here, once
    kp = (jnp.dot(k_ref[...], wk_ref[...], preferred_element_type=jnp.float32)
          + bk_ref[...])
    vp = (jnp.dot(v_ref[...], wv_ref[...], preferred_element_type=jnp.float32)
          + bv_ref[...])
    qp = qp.astype(cdtype)
    kp = kp.astype(cdtype)
    vp = vp.astype(cdtype)

    dim_nums = (((1,), (1,)), ((), ()))         # q_h @ k_h.T (contract d_sub)

    # Static loop over (batch-in-block, head); the unroll size is bounded by
    # the wrapper (block_batch * heads <= 32) to keep vreg pressure in check.
    ctx_blocks = []
    for b in range(block_batch):
        r0 = b * S
        # Additive mask bias, hoisted out of the head loop: 0 keep / -1e9 drop.
        bias = jnp.where(mask_ref[b].astype(jnp.int32) != 0,
                         jnp.float32(0.0), jnp.float32(-1e9))
        head_ctx = []
        for h in range(H):
            c0 = h * Ds
            q_h = qp[r0:r0 + S, c0:c0 + Ds]     # (S, d_sub)
            k_h = kp[r0:r0 + S, c0:c0 + Ds]
            v_h = vp[r0:r0 + S, c0:c0 + Ds]

            s = jax.lax.dot_general(q_h, k_h, dim_nums,
                                    preferred_element_type=jnp.float32)
            s = s + bias
            s = s - jnp.max(s, axis=-1, keepdims=True)
            p = jnp.exp(s)
            denom = jnp.sum(p, axis=-1, keepdims=True)
            if approx_softmax:
                p = p * pl.reciprocal(denom, approx=True)   # EUP slot
            else:
                p = p / denom
            head_ctx.append(jnp.dot(p.astype(cdtype), v_h,
                                    preferred_element_type=jnp.float32))
        # Lane concat -> (S, D): lane-dense, no masked sub-128 column stores.
        ctx_blocks.append(jnp.concatenate(head_ctx, axis=-1))

    ctx = ctx_blocks[0] if block_batch == 1 else jnp.concatenate(ctx_blocks, axis=0)
    out = (jnp.dot(ctx.astype(cdtype), wf_ref[...],
                   preferred_element_type=jnp.float32) + bf_ref[...])
    o_ref[...] = out.astype(o_ref.dtype)        # single lane-dense store


def _vmem_capacity_bytes():
    try:
        return int(pltpu.get_tpu_info().vmem_capacity_bytes)
    except Exception:
        return 64 * 1024 * 1024                 # conservative (v7x per-TC VMEM)


def _vmem_footprint(rows, bb, S, D, cd_size, out_size, weight_bufs):
    """Rough per-grid-step VMEM footprint (bytes)."""
    slab = rows * D
    io = 2 * 3 * slab * cd_size + 2 * slab * out_size   # double-buffered q,k,v + out
    msk = 2 * bb * S * S                                # int8 mask, double-buffered
    wts = weight_bufs * (4 * D * D * cd_size + 4 * D * 4)
    vals = 3 * slab * (4 + cd_size) + slab * 4 + 3 * S * S * 4  # qp/kp/vp, ctx, scores
    return io + msk + wts + vals


def _pick_block_batch(B, S, D, H, cd_size, out_size, vmem_budget,
                      target_rows=512, max_unroll=32):
    """Batch elements per grid step: fill the MXU M dim (~512 rows), keep the
    (bb*S, D) block lowerable (rows % 8 == 0 when bb < B), bound the static
    unroll, fit the VMEM budget, and keep >= 2 grid steps when possible."""
    divisors = [d for d in range(1, B + 1) if B % d == 0]

    def ok(bb):
        rows = bb * S
        if bb < B and rows % 8 != 0:
            return False
        if bb > 1 and bb * H > max_unroll:
            return False
        return _vmem_footprint(rows, bb, S, D, cd_size, out_size, 2) <= vmem_budget

    feasible = [d for d in divisors if ok(d)] or [1]
    under = [d for d in feasible if d * S <= target_rows]
    bb = max(under) if under else min(feasible)
    if bb == B and B > 1:                       # keep both v7x TensorCores busy
        smaller = [d for d in feasible if d < B]
        if smaller:
            bb = max(smaller)
    return bb


def _weight_specs(D, single_buffer):
    """Grid-invariant weight/bias specs; single-buffered when supported."""
    kwargs = {}
    if single_buffer and hasattr(pl, "Buffered"):
        kwargs = dict(pipeline_mode=pl.Buffered(1))
    try:
        full_w = pl.BlockSpec((D, D), lambda i: (0, 0), **kwargs)
        full_b = pl.BlockSpec((1, D), lambda i: (0, 0), **kwargs)
    except TypeError:
        full_w = pl.BlockSpec((D, D), lambda i: (0, 0))
        full_b = pl.BlockSpec((1, D), lambda i: (0, 0))
    return full_w, full_b


def multi_head_attention(q, k, v, mask, params, *, heads,
                         compute_dtype=jnp.bfloat16, approx_softmax=True):
    B, S, D = q.shape
    assert D % heads == 0
    d_sub = D // heads
    cd_size = jnp.dtype(compute_dtype).itemsize
    out_size = jnp.dtype(q.dtype).itemsize

    cap = _vmem_capacity_bytes()
    bb = _pick_block_batch(B, S, D, heads, cd_size, out_size, cap * 3 // 4)
    rows = bb * S

    wq, bq, wk, bk, wv, bv, wf, bf = params
    # Pre-transpose weights to (in, out) in compute dtype; biases stay f32.
    wq_t, wk_t, wv_t, wf_t = (w.T.astype(compute_dtype)
                              for w in (wq, wk, wv, wf))
    bq2, bk2, bv2, bf2 = (x.reshape(1, D).astype(jnp.float32)
                          for x in (bq, bk, bv, bf))

    # Flatten (B, S, D) -> (B*S, D) so blocks are 2-D row slabs.
    q2, k2, v2 = (x.reshape(B * S, D).astype(compute_dtype)
                  for x in (q, k, v))
    mask_i8 = mask.astype(jnp.int8)             # 4x less traffic than int32

    footprint = _vmem_footprint(rows, bb, S, D, cd_size, out_size, 2)
    vmem_limit = int(min(max(int(footprint * 1.3) + (4 << 20), 32 << 20),
                         cap - (cap >> 3)))

    kernel = functools.partial(mha_kernel, heads=heads, d_sub=d_sub, seq=S,
                               block_batch=bb, approx_softmax=approx_softmax)

    row_spec = pl.BlockSpec((rows, D), lambda i: (i, 0))
    mask_spec = pl.BlockSpec((bb, S, S), lambda i: (i, 0, 0))

    def run(single_buffer_weights):
        full_w, full_b = _weight_specs(D, single_buffer_weights)
        call = pl.pallas_call(
            kernel,
            out_shape=jax.ShapeDtypeStruct((B * S, D), q.dtype),
            grid_spec=pltpu.PrefetchScalarGridSpec(
                num_scalar_prefetch=0,
                grid=(B // bb,),
                in_specs=[row_spec, row_spec, row_spec, mask_spec,
                          full_w, full_b, full_w, full_b, full_w, full_b,
                          full_w, full_b],
                out_specs=row_spec,
            ),
            compiler_params=pltpu.CompilerParams(
                dimension_semantics=("parallel",),
                vmem_limit_bytes=vmem_limit,
            ),
        )
        return call(q2, k2, v2, mask_i8,
                    wq_t, bq2, wk_t, bk2, wv_t, bv2, wf_t, bf2)

    try:
        out = run(single_buffer_weights=True)
    except Exception:
        out = run(single_buffer_weights=False)  # fall back to default buffering
    return out.reshape(B, S, D)


def _reference(q, k, v, mask, params, *, heads):
    """Pure-JAX replica of the PyTorch forward (for verification)."""
    wq, bq, wk, bk, wv, bv, wf, bf = params
    B, S, D = q.shape
    d_sub = D // heads

    def lin(x, w, b):
        return x @ w.T + b

    qp = lin(q, wq, bq).reshape(B, S, heads, d_sub).transpose(0, 2, 1, 3)
    kp = lin(k, wk, bk).reshape(B, S, heads, d_sub).transpose(0, 2, 1, 3)
    vp = lin(v, wv, bv).reshape(B, S, heads, d_sub).transpose(0, 2, 1, 3)

    scores = jnp.einsum('bhqd,bhkd->bhqk', qp, kp) / math.sqrt(d_sub)
    scores = jnp.where(mask[:, None, :, :], scores, -1e9)
    scores = jax.nn.softmax(scores, axis=-1)
    out = jnp.einsum('bhqk,bhkd->bhqd', scores, vp)
    concat = out.transpose(0, 2, 1, 3).reshape(B, S, D)
    return lin(concat, wf, bf)


def init_params(key, d_model):
    """Deterministic init matching nn.Linear shapes: weight (out,in), bias (out,)."""
    bound = 1.0 / math.sqrt(d_model)
    keys = jax.random.split(key, 8)
    params = []
    for i in range(4):
        w = jax.random.uniform(keys[2 * i], (d_model, d_model),
                               minval=-bound, maxval=bound, dtype=jnp.float32)
        b = jax.random.uniform(keys[2 * i + 1], (d_model,),
                               minval=-bound, maxval=bound, dtype=jnp.float32)
        params += [w, b]
    return tuple(params)


if __name__ == "__main__":
    B, S, D, H = 2, 8, 32, 4

    key = jax.random.PRNGKey(0)
    kq, kk, kv, km, kp = jax.random.split(key, 5)

    q = jax.random.normal(kq, (B, S, D), dtype=jnp.float32)
    k = jax.random.normal(kk, (B, S, D), dtype=jnp.float32)
    v = jax.random.normal(kv, (B, S, D), dtype=jnp.float32)
    # boolean mask (B, S_q, S_k): lower-triangular causal-like pattern
    mask = jnp.tril(jnp.ones((S, S), dtype=bool))[None].repeat(B, axis=0)

    params = init_params(kp, D)
    ref = _reference(q, k, v, mask, params, heads=H)

    # 1) Exact-parity configuration (f32 operands, exact softmax divide).
    out_f32 = multi_head_attention(q, k, v, mask, params, heads=H,
                                   compute_dtype=jnp.float32,
                                   approx_softmax=False)
    out_f32 = jax.block_until_ready(out_f32)
    assert out_f32.shape == (B, S, D)
    assert jnp.allclose(out_f32, ref, atol=1e-3, rtol=1e-3), "f32 mismatch vs reference"

    # 2) Default fast configuration (bf16 MXU operands, approx reciprocal);
    #    looser tolerance accounts for bf16 operand rounding.
    out_fast = multi_head_attention(q, k, v, mask, params, heads=H)
    out_fast = jax.block_until_ready(out_fast)
    assert out_fast.shape == (B, S, D)
    assert jnp.allclose(out_fast, ref, atol=7e-2, rtol=5e-2), "bf16 mismatch vs reference"

    print("KERNEL_OK")
</pallas_src>

<mosaic_0001>
module attributes {stable_mosaic.version = 11 : i64} {
  func.func @mha_kernel(%arg0: i32, %arg1: memref<8x32xf32, #tpu.memory_space<vmem>>, %arg2: memref<8x32xf32, #tpu.memory_space<vmem>>, %arg3: memref<8x32xf32, #tpu.memory_space<vmem>>, %arg4: memref<1x8x8xi8, #tpu.memory_space<vmem>>, %arg5: memref<32x32xf32, #tpu.memory_space<vmem>>, %arg6: memref<1x32xf32, #tpu.memory_space<vmem>>, %arg7: memref<32x32xf32, #tpu.memory_space<vmem>>, %arg8: memref<1x32xf32, #tpu.memory_space<vmem>>, %arg9: memref<32x32xf32, #tpu.memory_space<vmem>>, %arg10: memref<1x32xf32, #tpu.memory_space<vmem>>, %arg11: memref<32x32xf32, #tpu.memory_space<vmem>>, %arg12: memref<1x32xf32, #tpu.memory_space<vmem>>, %arg13: memref<8x32xf32, #tpu.memory_space<vmem>>) attributes {dimension_semantics = [#tpu.dimension_semantics<parallel>], iteration_bounds = array<i64: 2>, scalar_prefetch = 0 : i64, scratch_operands = 0 : i64, tpu.core_type = #tpu.core_type<tc>, window_params = [{transform_indices = @transform_0, window_bounds = array<i64: 8, 32>}, {transform_indices = @transform_1, window_bounds = array<i64: 8, 32>}, {transform_indices = @transform_2, window_bounds = array<i64: 8, 32>}, {transform_indices = @transform_3, window_bounds = array<i64: 1, 8, 8>}, {pipeline_mode = #tpu.pipeline_mode<synchronous>, transform_indices = @transform_4, window_bounds = array<i64: 32, 32>}, {pipeline_mode = #tpu.pipeline_mode<synchronous>, transform_indices = @transform_5, window_bounds = array<i64: 1, 32>}, {pipeline_mode = #tpu.pipeline_mode<synchronous>, transform_indices = @transform_6, window_bounds = array<i64: 32, 32>}, {pipeline_mode = #tpu.pipeline_mode<synchronous>, transform_indices = @transform_7, window_bounds = array<i64: 1, 32>}, {pipeline_mode = #tpu.pipeline_mode<synchronous>, transform_indices = @transform_8, window_bounds = array<i64: 32, 32>}, {pipeline_mode = #tpu.pipeline_mode<synchronous>, transform_indices = @transform_9, window_bounds = array<i64: 1, 32>}, {pipeline_mode = #tpu.pipeline_mode<synchronous>, transform_indices = @transform_10, window_bounds = array<i64: 32, 32>}, {pipeline_mode = #tpu.pipeline_mode<synchronous>, transform_indices = @transform_11, window_bounds = array<i64: 1, 32>}, {transform_indices = @transform_12, window_bounds = array<i64: 8, 32>}]} {
    %c0 = arith.constant 0 : index
    %c0_0 = arith.constant 0 : index
    %0 = vector.load %arg1[%c0, %c0_0] : memref<8x32xf32, #tpu.memory_space<vmem>>, vector<8x32xf32>
    %c0_1 = arith.constant 0 : index
    %c0_2 = arith.constant 0 : index
    %1 = vector.load %arg5[%c0_1, %c0_2] : memref<32x32xf32, #tpu.memory_space<vmem>>, vector<32x32xf32>
    %cst = arith.constant dense<0.000000e+00> : vector<8x32xf32>
    %2 = tpu.matmul %0, %1, %cst {dimension_numbers = #tpu.dot_dimension_numbers<[1], [0], [0], [1], [0, 0, 1, 1], [], []>} : vector<8x32xf32>, vector<32x32xf32>, vector<8x32xf32> -> vector<8x32xf32>
    %c0_3 = arith.constant 0 : index
    %c0_4 = arith.constant 0 : index
    %3 = vector.load %arg6[%c0_3, %c0_4] : memref<1x32xf32, #tpu.memory_space<vmem>>, vector<1x32xf32>
    %4 = vector.broadcast %3 : vector<1x32xf32> to vector<8x32xf32>
    %5 = arith.addf %2, %4 : vector<8x32xf32>
    %cst_5 = arith.constant 0.353553385 : f32
    %6 = vector.broadcast %cst_5 : f32 to vector<8x32xf32>
    %7 = arith.mulf %5, %6 : vector<8x32xf32>
    %c0_6 = arith.constant 0 : index
    %c0_7 = arith.constant 0 : index
    %8 = vector.load %arg2[%c0_6, %c0_7] : memref<8x32xf32, #tpu.memory_space<vmem>>, vector<8x32xf32>
    %c0_8 = arith.constant 0 : index
    %c0_9 = arith.constant 0 : index
    %9 = vector.load %arg7[%c0_8, %c0_9] : memref<32x32xf32, #tpu.memory_space<vmem>>, vector<32x32xf32>
    %cst_10 = arith.constant dense<0.000000e+00> : vector<8x32xf32>
    %10 = tpu.matmul %8, %9, %cst_10 {dimension_numbers = #tpu.dot_dimension_numbers<[1], [0], [0], [1], [0, 0, 1, 1], [], []>} : vector<8x32xf32>, vector<32x32xf32>, vector<8x32xf32> -> vector<8x32xf32>
    %c0_11 = arith.constant 0 : index
    %c0_12 = arith.constant 0 : index
    %11 = vector.load %arg8[%c0_11, %c0_12] : memref<1x32xf32, #tpu.memory_space<vmem>>, vector<1x32xf32>
    %12 = vector.broadcast %11 : vector<1x32xf32> to vector<8x32xf32>
    %13 = arith.addf %10, %12 : vector<8x32xf32>
    %c0_13 = arith.constant 0 : index
    %c0_14 = arith.constant 0 : index
    %14 = vector.load %arg3[%c0_13, %c0_14] : memref<8x32xf32, #tpu.memory_space<vmem>>, vector<8x32xf32>
    %c0_15 = arith.constant 0 : index
    %c0_16 = arith.constant 0 : index
    %15 = vector.load %arg9[%c0_15, %c0_16] : memref<32x32xf32, #tpu.memory_space<vmem>>, vector<32x32xf32>
    %cst_17 = arith.constant dense<0.000000e+00> : vector<8x32xf32>
    %16 = tpu.matmul %14, %15, %cst_17 {dimension_numbers = #tpu.dot_dimension_numbers<[1], [0], [0], [1], [0, 0, 1, 1], [], []>} : vector<8x32xf32>, vector<32x32xf32>, vector<8x32xf32> -> vector<8x32xf32>
    %c0_18 = arith.constant 0 : index
    %c0_19 = arith.constant 0 : index
    %17 = vector.load %arg10[%c0_18, %c0_19] : memref<1x32xf32, #tpu.memory_space<vmem>>, vector<1x32xf32>
    %18 = vector.broadcast %17 : vector<1x32xf32> to vector<8x32xf32>
    %19 = arith.addf %16, %18 : vector<8x32xf32>
    %c0_20 = arith.constant 0 : index
    %c0_21 = arith.constant 0 : index
    %c0_22 = arith.constant 0 : index
    %20 = vector.load %arg4[%c0_20, %c0_21, %c0_22] : memref<1x8x8xi8, #tpu.memory_space<vmem>>, vector<1x8x8xi8>
    %21 = vector.shape_cast %20 : vector<1x8x8xi8> to vector<8x8xi8>
    %22 = arith.extsi %21 : vector<8x8xi8> to vector<8x8xi32>
    %c0_i32 = arith.constant 0 : i32
    %23 = vector.broadcast %c0_i32 : i32 to vector<8x8xi32>
    %24 = arith.cmpi ne, %22, %23 : vector<8x8xi32>
    %cst_23 = arith.constant 0.000000e+00 : f32
    %cst_24 = arith.constant -1.000000e+09 : f32
    %25 = vector.broadcast %cst_23 : f32 to vector<8x8xf32>
    %26 = vector.broadcast %cst_24 : f32 to vector<8x8xf32>
    %27 = arith.select %24, %25, %26 : vector<8x8xi1>, vector<8x8xf32>
    %28 = vector.extract_strided_slice %7 {offsets = [0, 0], sizes = [8, 8], strides = [1, 1]} : vector<8x32xf32> to vector<8x8xf32>
    %29 = vector.extract_strided_slice %13 {offsets = [0, 0], sizes = [8, 8], strides = [1, 1]} : vector<8x32xf32> to vector<8x8xf32>
    %30 = vector.extract_strided_slice %19 {offsets = [0, 0], sizes = [8, 8], strides = [1, 1]} : vector<8x32xf32> to vector<8x8xf32>
    %cst_25 = arith.constant dense<0.000000e+00> : vector<8x8xf32>
    %31 = tpu.matmul %28, %29, %cst_25 {dimension_numbers = #tpu.dot_dimension_numbers<[1], [1], [0], [0], [0, 0, 1, 0], [], []>} : vector<8x8xf32>, vector<8x8xf32>, vector<8x8xf32> -> vector<8x8xf32>
    %32 = arith.addf %31, %27 : vector<8x8xf32>
    %cst_26 = arith.constant dense<0xFF800000> : vector<8xf32>
    %33 = vector.multi_reduction <maximumf>, %32, %cst_26 [1] : vector<8x8xf32> to vector<8xf32>
    %34 = vector.shape_cast %33 : vector<8xf32> to vector<8x1xf32>
    %35 = vector.broadcast %34 : vector<8x1xf32> to vector<8x8xf32>
    %36 = arith.subf %32, %35 : vector<8x8xf32>
    %37 = math.exp %36 : vector<8x8xf32>
    %cst_27 = arith.constant dense<0.000000e+00> : vector<8xf32>
    %38 = vector.multi_reduction <add>, %37, %cst_27 [1] : vector<8x8xf32> to vector<8xf32>
    %39 = vector.shape_cast %38 : vector<8xf32> to vector<8x1xf32>
    %40 = vector.broadcast %39 : vector<8x1xf32> to vector<8x8xf32>
    %41 = arith.divf %37, %40 : vector<8x8xf32>
    %cst_28 = arith.constant dense<0.000000e+00> : vector<8x8xf32>
    %42 = tpu.matmul %41, %30, %cst_28 {dimension_numbers = #tpu.dot_dimension_numbers<[1], [0], [0], [1], [0, 0, 1, 1], [], []>} : vector<8x8xf32>, vector<8x8xf32>, vector<8x8xf32> -> vector<8x8xf32>
    %43 = vector.extract_strided_slice %7 {offsets = [0, 8], sizes = [8, 8], strides = [1, 1]} : vector<8x32xf32> to vector<8x8xf32>
    %44 = vector.extract_strided_slice %13 {offsets = [0, 8], sizes = [8, 8], strides = [1, 1]} : vector<8x32xf32> to vector<8x8xf32>
    %45 = vector.extract_strided_slice %19 {offsets = [0, 8], sizes = [8, 8], strides = [1, 1]} : vector<8x32xf32> to vector<8x8xf32>
    %cst_29 = arith.constant dense<0.000000e+00> : vector<8x8xf32>
    %46 = tpu.matmul %43, %44, %cst_29 {dimension_numbers = #tpu.dot_dimension_numbers<[1], [1], [0], [0], [0, 0, 1, 0], [], []>} : vector<8x8xf32>, vector<8x8xf32>, vector<8x8xf32> -> vector<8x8xf32>
    %47 = arith.addf %46, %27 : vector<8x8xf32>
    %cst_30 = arith.constant dense<0xFF800000> : vector<8xf32>
    %48 = vector.multi_reduction <maximumf>, %47, %cst_30 [1] : vector<8x8xf32> to vector<8xf32>
    %49 = vector.shape_cast %48 : vector<8xf32> to vector<8x1xf32>
    %50 = vector.broadcast %49 : vector<8x1xf32> to vector<8x8xf32>
    %51 = arith.subf %47, %50 : vector<8x8xf32>
    %52 = math.exp %51 : vector<8x8xf32>
    %cst_31 = arith.constant dense<0.000000e+00> : vector<8xf32>
    %53 = vector.multi_reduction <add>, %52, %cst_31 [1] : vector<8x8xf32> to vector<8xf32>
    %54 = vector.shape_cast %53 : vector<8xf32> to vector<8x1xf32>
    %55 = vector.broadcast %54 : vector<8x1xf32> to vector<8x8xf32>
    %56 = arith.divf %52, %55 : vector<8x8xf32>
    %cst_32 = arith.constant dense<0.000000e+00> : vector<8x8xf32>
    %57 = tpu.matmul %56, %45, %cst_32 {dimension_numbers = #tpu.dot_dimension_numbers<[1], [0], [0], [1], [0, 0, 1, 1], [], []>} : vector<8x8xf32>, vector<8x8xf32>, vector<8x8xf32> -> vector<8x8xf32>
    %58 = vector.extract_strided_slice %7 {offsets = [0, 16], sizes = [8, 8], strides = [1, 1]} : vector<8x32xf32> to vector<8x8xf32>
    %59 = vector.extract_strided_slice %13 {offsets = [0, 16], sizes = [8, 8], strides = [1, 1]} : vector<8x32xf32> to vector<8x8xf32>
    %60 = vector.extract_strided_slice %19 {offsets = [0, 16], sizes = [8, 8], strides = [1, 1]} : vector<8x32xf32> to vector<8x8xf32>
    %cst_33 = arith.constant dense<0.000000e+00> : vector<8x8xf32>
    %61 = tpu.matmul %58, %59, %cst_33 {dimension_numbers = #tpu.dot_dimension_numbers<[1], [1], [0], [0], [0, 0, 1, 0], [], []>} : vector<8x8xf32>, vector<8x8xf32>, vector<8x8xf32> -> vector<8x8xf32>
    %62 = arith.addf %61, %27 : vector<8x8xf32>
    %cst_34 = arith.constant dense<0xFF800000> : vector<8xf32>
    %63 = vector.multi_reduction <maximumf>, %62, %cst_34 [1] : vector<8x8xf32> to vector<8xf32>
    %64 = vector.shape_cast %63 : vector<8xf32> to vector<8x1xf32>
    %65 = vector.broadcast %64 : vector<8x1xf32> to vector<8x8xf32>
    %66 = arith.subf %62, %65 : vector<8x8xf32>
    %67 = math.exp %66 : vector<8x8xf32>
    %cst_35 = arith.constant dense<0.000000e+00> : vector<8xf32>
    %68 = vector.multi_reduction <add>, %67, %cst_35 [1] : vector<8x8xf32> to vector<8xf32>
    %69 = vector.shape_cast %68 : vector<8xf32> to vector<8x1xf32>
    %70 = vector.broadcast %69 : vector<8x1xf32> to vector<8x8xf32>
    %71 = arith.divf %67, %70 : vector<8x8xf32>
    %cst_36 = arith.constant dense<0.000000e+00> : vector<8x8xf32>
    %72 = tpu.matmul %71, %60, %cst_36 {dimension_numbers = #tpu.dot_dimension_numbers<[1], [0], [0], [1], [0, 0, 1, 1], [], []>} : vector<8x8xf32>, vector<8x8xf32>, vector<8x8xf32> -> vector<8x8xf32>
    %73 = vector.extract_strided_slice %7 {offsets = [0, 24], sizes = [8, 8], strides = [1, 1]} : vector<8x32xf32> to vector<8x8xf32>
    %74 = vector.extract_strided_slice %13 {offsets = [0, 24], sizes = [8, 8], strides = [1, 1]} : vector<8x32xf32> to vector<8x8xf32>
    %75 = vector.extract_strided_slice %19 {offsets = [0, 24], sizes = [8, 8], strides = [1, 1]} : vector<8x32xf32> to vector<8x8xf32>
    %cst_37 = arith.constant dense<0.000000e+00> : vector<8x8xf32>
    %76 = tpu.matmul %73, %74, %cst_37 {dimension_numbers = #tpu.dot_dimension_numbers<[1], [1], [0], [0], [0, 0, 1, 0], [], []>} : vector<8x8xf32>, vector<8x8xf32>, vector<8x8xf32> -> vector<8x8xf32>
    %77 = arith.addf %76, %27 : vector<8x8xf32>
    %cst_38 = arith.constant dense<0xFF800000> : vector<8xf32>
    %78 = vector.multi_reduction <maximumf>, %77, %cst_38 [1] : vector<8x8xf32> to vector<8xf32>
    %79 = vector.shape_cast %78 : vector<8xf32> to vector<8x1xf32>
    %80 = vector.broadcast %79 : vector<8x1xf32> to vector<8x8xf32>
    %81 = arith.subf %77, %80 : vector<8x8xf32>
    %82 = math.exp %81 : vector<8x8xf32>
    %cst_39 = arith.constant dense<0.000000e+00> : vector<8xf32>
    %83 = vector.multi_reduction <add>, %82, %cst_39 [1] : vector<8x8xf32> to vector<8xf32>
    %84 = vector.shape_cast %83 : vector<8xf32> to vector<8x1xf32>
    %85 = vector.broadcast %84 : vector<8x1xf32> to vector<8x8xf32>
    %86 = arith.divf %82, %85 : vector<8x8xf32>
    %cst_40 = arith.constant dense<0.000000e+00> : vector<8x8xf32>
    %87 = tpu.matmul %86, %75, %cst_40 {dimension_numbers = #tpu.dot_dimension_numbers<[1], [0], [0], [1], [0, 0, 1, 1], [], []>} : vector<8x8xf32>, vector<8x8xf32>, vector<8x8xf32> -> vector<8x8xf32>
    %88 = tpu.concatenate %42, %57, %72, %87 in 1 : vector<8x8xf32>, vector<8x8xf32>, vector<8x8xf32>, vector<8x8xf32> -> vector<8x32xf32>
    %c0_41 = arith.constant 0 : index
    %c0_42 = arith.constant 0 : index
    %89 = vector.load %arg11[%c0_41, %c0_42] : memref<32x32xf32, #tpu.memory_space<vmem>>, vector<32x32xf32>
    %cst_43 = arith.constant dense<0.000000e+00> : vector<8x32xf32>
    %90 = tpu.matmul %88, %89, %cst_43 {dimension_numbers = #tpu.dot_dimension_numbers<[1], [0], [0], [1], [0, 0, 1, 1], [], []>} : vector<8x32xf32>, vector<32x32xf32>, vector<8x32xf32> -> vector<8x32xf32>
    %c0_44 = arith.constant 0 : index
    %c0_45 = arith.constant 0 : index
    %91 = vector.load %arg12[%c0_44, %c0_45] : memref<1x32xf32, #tpu.memory_space<vmem>>, vector<1x32xf32>
    %92 = vector.broadcast %91 : vector<1x32xf32> to vector<8x32xf32>
    %93 = arith.addf %90, %92 : vector<8x32xf32>
    %c0_46 = arith.constant 0 : index
    %c0_47 = arith.constant 0 : index
    %94 = vector.load %arg13[%c0_46, %c0_47] : memref<8x32xf32, #tpu.memory_space<vmem>>, vector<8x32xf32>
    tpu.vector_store %arg13[%c0_46, %c0_47], %93 {strides = array<i32>} : memref<8x32xf32, #tpu.memory_space<vmem>>, vector<8x32xf32>,
    return
  }
  func.func @transform_0(%arg0: i32) -> (i32, i32) {
    %c0_i32 = arith.constant 0 : i32
    %c0_i32_0 = arith.constant 0 : i32
    return %arg0, %c0_i32 : i32, i32
  }
  func.func @transform_1(%arg0: i32) -> (i32, i32) {
    %c0_i32 = arith.constant 0 : i32
    %c0_i32_0 = arith.constant 0 : i32
    return %arg0, %c0_i32 : i32, i32
  }
  func.func @transform_2(%arg0: i32) -> (i32, i32) {
    %c0_i32 = arith.constant 0 : i32
    %c0_i32_0 = arith.constant 0 : i32
    return %arg0, %c0_i32 : i32, i32
  }
  func.func @transform_3(%arg0: i32) -> (i32, i32, i32) {
    %c0_i32 = arith.constant 0 : i32
    %c0_i32_0 = arith.constant 0 : i32
    %c0_i32_1 = arith.constant 0 : i32
    return %arg0, %c0_i32, %c0_i32_0 : i32, i32, i32
  }
  func.func @transform_4(%arg0: i32) -> (i32, i32) {
    %c0_i32 = arith.constant 0 : i32
    %c0_i32_0 = arith.constant 0 : i32
    %c0_i32_1 = arith.constant 0 : i32
    return %c0_i32, %c0_i32_0 : i32, i32
  }
  func.func @transform_5(%arg0: i32) -> (i32, i32) {
    %c0_i32 = arith.constant 0 : i32
    %c0_i32_0 = arith.constant 0 : i32
    %c0_i32_1 = arith.constant 0 : i32
    return %c0_i32, %c0_i32_0 : i32, i32
  }
  func.func @transform_6(%arg0: i32) -> (i32, i32) {
    %c0_i32 = arith.constant 0 : i32
    %c0_i32_0 = arith.constant 0 : i32
    %c0_i32_1 = arith.constant 0 : i32
    return %c0_i32, %c0_i32_0 : i32, i32
  }
  func.func @transform_7(%arg0: i32) -> (i32, i32) {
    %c0_i32 = arith.constant 0 : i32
    %c0_i32_0 = arith.constant 0 : i32
    %c0_i32_1 = arith.constant 0 : i32
    return %c0_i32, %c0_i32_0 : i32, i32
  }
  func.func @transform_8(%arg0: i32) -> (i32, i32) {
    %c0_i32 = arith.constant 0 : i32
    %c0_i32_0 = arith.constant 0 : i32
    %c0_i32_1 = arith.constant 0 : i32
    return %c0_i32, %c0_i32_0 : i32, i32
  }
  func.func @transform_9(%arg0: i32) -> (i32, i32) {
    %c0_i32 = arith.constant 0 : i32
    %c0_i32_0 = arith.constant 0 : i32
    %c0_i32_1 = arith.constant 0 : i32
    return %c0_i32, %c0_i32_0 : i32, i32
  }
  func.func @transform_10(%arg0: i32) -> (i32, i32) {
    %c0_i32 = arith.constant 0 : i32
    %c0_i32_0 = arith.constant 0 : i32
    %c0_i32_1 = arith.constant 0 : i32
    return %c0_i32, %c0_i32_0 : i32, i32
  }
  func.func @transform_11(%arg0: i32) -> (i32, i32) {
    %c0_i32 = arith.constant 0 : i32
    %c0_i32_0 = arith.constant 0 : i32
    %c0_i32_1 = arith.constant 0 : i32
    return %c0_i32, %c0_i32_0 : i32, i32
  }
  func.func @transform_12(%arg0: i32) -> (i32, i32) {
    %c0_i32 = arith.constant 0 : i32
    %c0_i32_0 = arith.constant 0 : i32
    return %arg0, %c0_i32 : i32, i32
  }
}

module attributes {stable_mosaic.version = 11 : i64} {
  func.func @mha_kernel(%arg0: i32, %arg1: memref<8x32xf32, #tpu.memory_space<vmem>>, %arg2: memref<8x32xf32, #tpu.memory_space<vmem>>, %arg3: memref<8x32xf32, #tpu.memory_space<vmem>>, %arg4: memref<1x8x8xi8, #tpu.memory_space<vmem>>, %arg5: memref<32x32xf32, #tpu.memory_space<vmem>>, %arg6: memref<1x32xf32, #tpu.memory_space<vmem>>, %arg7: memref<32x32xf32, #tpu.memory_space<vmem>>, %arg8: memref<1x32xf32, #tpu.memory_space<vmem>>, %arg9: memref<32x32xf32, #tpu.memory_space<vmem>>, %arg10: memref<1x32xf32, #tpu.memory_space<vmem>>, %arg11: memref<32x32xf32, #tpu.memory_space<vmem>>, %arg12: memref<1x32xf32, #tpu.memory_space<vmem>>, %arg13: memref<8x32xf32, #tpu.memory_space<vmem>>) attributes {dimension_semantics = [#tpu.dimension_semantics<parallel>], iteration_bounds = array<i64: 2>, scalar_prefetch = 0 : i64, scratch_operands = 0 : i64, tpu.core_type = #tpu.core_type<tc>, window_params = [{transform_indices = @transform_0, window_bounds = array<i64: 8, 32>}, {transform_indices = @transform_1, window_bounds = array<i64: 8, 32>}, {transform_indices = @transform_2, window_bounds = array<i64: 8, 32>}, {transform_indices = @transform_3, window_bounds = array<i64: 1, 8, 8>}, {pipeline_mode = #tpu.pipeline_mode<synchronous>, transform_indices = @transform_4, window_bounds = array<i64: 32, 32>}, {pipeline_mode = #tpu.pipeline_mode<synchronous>, transform_indices = @transform_5, window_bounds = array<i64: 1, 32>}, {pipeline_mode = #tpu.pipeline_mode<synchronous>, transform_indices = @transform_6, window_bounds = array<i64: 32, 32>}, {pipeline_mode = #tpu.pipeline_mode<synchronous>, transform_indices = @transform_7, window_bounds = array<i64: 1, 32>}, {pipeline_mode = #tpu.pipeline_mode<synchronous>, transform_indices = @transform_8, window_bounds = array<i64: 32, 32>}, {pipeline_mode = #tpu.pipeline_mode<synchronous>, transform_indices = @transform_9, window_bounds = array<i64: 1, 32>}, {pipeline_mode = #tpu.pipeline_mode<synchronous>, transform_indices = @transform_10, window_bounds = array<i64: 32, 32>}, {pipeline_mode = #tpu.pipeline_mode<synchronous>, transform_indices = @transform_11, window_bounds = array<i64: 1, 32>}, {transform_indices = @transform_12, window_bounds = array<i64: 8, 32>}]} {
    %c0 = arith.constant 0 : index
    %c0_0 = arith.constant 0 : index
    %0 = vector.load %arg1[%c0, %c0_0] : memref<8x32xf32, #tpu.memory_space<vmem>>, vector<8x32xf32>
    %c0_1 = arith.constant 0 : index
    %c0_2 = arith.constant 0 : index
    %1 = vector.load %arg5[%c0_1, %c0_2] : memref<32x32xf32, #tpu.memory_space<vmem>>, vector<32x32xf32>
    %cst = arith.constant dense<0.000000e+00> : vector<8x32xf32>
    %2 = tpu.matmul %0, %1, %cst {dimension_numbers = #tpu.dot_dimension_numbers<[1], [0], [0], [1], [0, 0, 1, 1], [], []>} : vector<8x32xf32>, vector<32x32xf32>, vector<8x32xf32> -> vector<8x32xf32>
    %c0_3 = arith.constant 0 : index
    %c0_4 = arith.constant 0 : index
    %3 = vector.load %arg6[%c0_3, %c0_4] : memref<1x32xf32, #tpu.memory_space<vmem>>, vector<1x32xf32>
    %4 = vector.broadcast %3 : vector<1x32xf32> to vector<8x32xf32>
    %5 = arith.addf %2, %4 : vector<8x32xf32>
    %cst_5 = arith.constant 0.353553385 : f32
    %6 = vector.broadcast %cst_5 : f32 to vector<8x32xf32>
    %7 = arith.mulf %5, %6 : vector<8x32xf32>
    %c0_6 = arith.constant 0 : index
    %c0_7 = arith.constant 0 : index
    %8 = vector.load %arg2[%c0_6, %c0_7] : memref<8x32xf32, #tpu.memory_space<vmem>>, vector<8x32xf32>
    %c0_8 = arith.constant 0 : index
    %c0_9 = arith.constant 0 : index
    %9 = vector.load %arg7[%c0_8, %c0_9] : memref<32x32xf32, #tpu.memory_space<vmem>>, vector<32x32xf32>
    %cst_10 = arith.constant dense<0.000000e+00> : vector<8x32xf32>
    %10 = tpu.matmul %8, %9, %cst_10 {dimension_numbers = #tpu.dot_dimension_numbers<[1], [0], [0], [1], [0, 0, 1, 1], [], []>} : vector<8x32xf32>, vector<32x32xf32>, vector<8x32xf32> -> vector<8x32xf32>
    %c0_11 = arith.constant 0 : index
    %c0_12 = arith.constant 0 : index
    %11 = vector.load %arg8[%c0_11, %c0_12] : memref<1x32xf32, #tpu.memory_space<vmem>>, vector<1x32xf32>
    %12 = vector.broadcast %11 : vector<1x32xf32> to vector<8x32xf32>
    %13 = arith.addf %10, %12 : vector<8x32xf32>
    %c0_13 = arith.constant 0 : index
    %c0_14 = arith.constant 0 : index
    %14 = vector.load %arg3[%c0_13, %c0_14] : memref<8x32xf32, #tpu.memory_space<vmem>>, vector<8x32xf32>
    %c0_15 = arith.constant 0 : index
    %c0_16 = arith.constant 0 : index
    %15 = vector.load %arg9[%c0_15, %c0_16] : memref<32x32xf32, #tpu.memory_space<vmem>>, vector<32x32xf32>
    %cst_17 = arith.constant dense<0.000000e+00> : vector<8x32xf32>
    %16 = tpu.matmul %14, %15, %cst_17 {dimension_numbers = #tpu.dot_dimension_numbers<[1], [0], [0], [1], [0, 0, 1, 1], [], []>} : vector<8x32xf32>, vector<32x32xf32>, vector<8x32xf32> -> vector<8x32xf32>
    %c0_18 = arith.constant 0 : index
    %c0_19 = arith.constant 0 : index
    %17 = vector.load %arg10[%c0_18, %c0_19] : memref<1x32xf32, #tpu.memory_space<vmem>>, vector<1x32xf32>
    %18 = vector.broadcast %17 : vector<1x32xf32> to vector<8x32xf32>
    %19 = arith.addf %16, %18 : vector<8x32xf32>
    %c0_20 = arith.constant 0 : index
    %c0_21 = arith.constant 0 : index
    %c0_22 = arith.constant 0 : index
    %20 = vector.load %arg4[%c0_20, %c0_21, %c0_22] : memref<1x8x8xi8, #tpu.memory_space<vmem>>, vector<1x8x8xi8>
    %21 = vector.shape_cast %20 : vector<1x8x8xi8> to vector<8x8xi8>
    %22 = arith.extsi %21 : vector<8x8xi8> to vector<8x8xi32>
    %c0_i32 = arith.constant 0 : i32
    %23 = vector.broadcast %c0_i32 : i32 to vector<8x8xi32>
    %24 = arith.cmpi ne, %22, %23 : vector<8x8xi32>
    %cst_23 = arith.constant 0.000000e+00 : f32
    %cst_24 = arith.constant -1.000000e+09 : f32
    %25 = vector.broadcast %cst_23 : f32 to vector<8x8xf32>
    %26 = vector.broadcast %cst_24 : f32 to vector<8x8xf32>
    %27 = arith.select %24, %25, %26 : vector<8x8xi1>, vector<8x8xf32>
    %28 = vector.extract_strided_slice %7 {offsets = [0, 0], sizes = [8, 8], strides = [1, 1]} : vector<8x32xf32> to vector<8x8xf32>
    %29 = vector.extract_strided_slice %13 {offsets = [0, 0], sizes = [8, 8], strides = [1, 1]} : vector<8x32xf32> to vector<8x8xf32>
    %30 = vector.extract_strided_slice %19 {offsets = [0, 0], sizes = [8, 8], strides = [1, 1]} : vector<8x32xf32> to vector<8x8xf32>
    %cst_25 = arith.constant dense<0.000000e+00> : vector<8x8xf32>
    %31 = tpu.matmul %28, %29, %cst_25 {dimension_numbers = #tpu.dot_dimension_numbers<[1], [1], [0], [0], [0, 0, 1, 0], [], []>} : vector<8x8xf32>, vector<8x8xf32>, vector<8x8xf32> -> vector<8x8xf32>
    %32 = arith.addf %31, %27 : vector<8x8xf32>
    %cst_26 = arith.constant dense<0xFF800000> : vector<8xf32>
    %33 = vector.multi_reduction <maximumf>, %32, %cst_26 [1] : vector<8x8xf32> to vector<8xf32>
    %34 = vector.shape_cast %33 : vector<8xf32> to vector<8x1xf32>
    %35 = vector.broadcast %34 : vector<8x1xf32> to vector<8x8xf32>
    %36 = arith.subf %32, %35 : vector<8x8xf32>
    %37 = math.exp %36 : vector<8x8xf32>
    %cst_27 = arith.constant dense<0.000000e+00> : vector<8xf32>
    %38 = vector.multi_reduction <add>, %37, %cst_27 [1] : vector<8x8xf32> to vector<8xf32>
    %39 = vector.shape_cast %38 : vector<8xf32> to vector<8x1xf32>
    %40 = vector.broadcast %39 : vector<8x1xf32> to vector<8x8xf32>
    %41 = arith.divf %37, %40 : vector<8x8xf32>
    %cst_28 = arith.constant dense<0.000000e+00> : vector<8x8xf32>
    %42 = tpu.matmul %41, %30, %cst_28 {dimension_numbers = #tpu.dot_dimension_numbers<[1], [0], [0], [1], [0, 0, 1, 1], [], []>} : vector<8x8xf32>, vector<8x8xf32>, vector<8x8xf32> -> vector<8x8xf32>
    %43 = vector.extract_strided_slice %7 {offsets = [0, 8], sizes = [8, 8], strides = [1, 1]} : vector<8x32xf32> to vector<8x8xf32>
    %44 = vector.extract_strided_slice %13 {offsets = [0, 8], sizes = [8, 8], strides = [1, 1]} : vector<8x32xf32> to vector<8x8xf32>
    %45 = vector.extract_strided_slice %19 {offsets = [0, 8], sizes = [8, 8], strides = [1, 1]} : vector<8x32xf32> to vector<8x8xf32>
    %cst_29 = arith.constant dense<0.000000e+00> : vector<8x8xf32>
    %46 = tpu.matmul %43, %44, %cst_29 {dimension_numbers = #tpu.dot_dimension_numbers<[1], [1], [0], [0], [0, 0, 1, 0], [], []>} : vector<8x8xf32>, vector<8x8xf32>, vector<8x8xf32> -> vector<8x8xf32>
    %47 = arith.addf %46, %27 : vector<8x8xf32>
    %cst_30 = arith.constant dense<0xFF800000> : vector<8xf32>
    %48 = vector.multi_reduction <maximumf>, %47, %cst_30 [1] : vector<8x8xf32> to vector<8xf32>
    %49 = vector.shape_cast %48 : vector<8xf32> to vector<8x1xf32>
    %50 = vector.broadcast %49 : vector<8x1xf32> to vector<8x8xf32>
    %51 = arith.subf %47, %50 : vector<8x8xf32>
    %52 = math.exp %51 : vector<8x8xf32>
    %cst_31 = arith.constant dense<0.000000e+00> : vector<8xf32>
    %53 = vector.multi_reduction <add>, %52, %cst_31 [1] : vector<8x8xf32> to vector<8xf32>
    %54 = vector.shape_cast %53 : vector<8xf32> to vector<8x1xf32>
    %55 = vector.broadcast %54 : vector<8x1xf32> to vector<8x8xf32>
    %56 = arith.divf %52, %55 : vector<8x8xf32>
    %cst_32 = arith.constant dense<0.000000e+00> : vector<8x8xf32>
    %57 = tpu.matmul %56, %45, %cst_32 {dimension_numbers = #tpu.dot_dimension_numbers<[1], [0], [0], [1], [0, 0, 1, 1], [], []>} : vector<8x8xf32>, vector<8x8xf32>, vector<8x8xf32> -> vector<8x8xf32>
    %58 = vector.extract_strided_slice %7 {offsets = [0, 16], sizes = [8, 8], strides = [1, 1]} : vector<8x32xf32> to vector<8x8xf32>
    %59 = vector.extract_strided_slice %13 {offsets = [0, 16], sizes = [8, 8], strides = [1, 1]} : vector<8x32xf32> to vector<8x8xf32>
    %60 = vector.extract_strided_slice %19 {offsets = [0, 16], sizes = [8, 8], strides = [1, 1]} : vector<8x32xf32> to vector<8x8xf32>
    %cst_33 = arith.constant dense<0.000000e+00> : vector<8x8xf32>
    %61 = tpu.matmul %58, %59, %cst_33 {dimension_numbers = #tpu.dot_dimension_numbers<[1], [1], [0], [0], [0, 0, 1, 0], [], []>} : vector<8x8xf32>, vector<8x8xf32>, vector<8x8xf32> -> vector<8x8xf32>
    %62 = arith.addf %61, %27 : vector<8x8xf32>
    %cst_34 = arith.constant dense<0xFF800000> : vector<8xf32>
    %63 = vector.multi_reduction <maximumf>, %62, %cst_34 [1] : vector<8x8xf32> to vector<8xf32>
    %64 = vector.shape_cast %63 : vector<8xf32> to vector<8x1xf32>
    %65 = vector.broadcast %64 : vector<8x1xf32> to vector<8x8xf32>
    %66 = arith.subf %62, %65 : vector<8x8xf32>
    %67 = math.exp %66 : vector<8x8xf32>
    %cst_35 = arith.constant dense<0.000000e+00> : vector<8xf32>
    %68 = vector.multi_reduction <add>, %67, %cst_35 [1] : vector<8x8xf32> to vector<8xf32>
    %69 = vector.shape_cast %68 : vector<8xf32> to vector<8x1xf32>
    %70 = vector.broadcast %69 : vector<8x1xf32> to vector<8x8xf32>
    %71 = arith.divf %67, %70 : vector<8x8xf32>
    %cst_36 = arith.constant dense<0.000000e+00> : vector<8x8xf32>
    %72 = tpu.matmul %71, %60, %cst_36 {dimension_numbers = #tpu.dot_dimension_numbers<[1], [0], [0], [1], [0, 0, 1, 1], [], []>} : vector<8x8xf32>, vector<8x8xf32>, vector<8x8xf32> -> vector<8x8xf32>
    %73 = vector.extract_strided_slice %7 {offsets = [0, 24], sizes = [8, 8], strides = [1, 1]} : vector<8x32xf32> to vector<8x8xf32>
    %74 = vector.extract_strided_slice %13 {offsets = [0, 24], sizes = [8, 8], strides = [1, 1]} : vector<8x32xf32> to vector<8x8xf32>
    %75 = vector.extract_strided_slice %19 {offsets = [0, 24], sizes = [8, 8], strides = [1, 1]} : vector<8x32xf32> to vector<8x8xf32>
    %cst_37 = arith.constant dense<0.000000e+00> : vector<8x8xf32>
    %76 = tpu.matmul %73, %74, %cst_37 {dimension_numbers = #tpu.dot_dimension_numbers<[1], [1], [0], [0], [0, 0, 1, 0], [], []>} : vector<8x8xf32>, vector<8x8xf32>, vector<8x8xf32> -> vector<8x8xf32>
    %77 = arith.addf %76, %27 : vector<8x8xf32>
    %cst_38 = arith.constant dense<0xFF800000> : vector<8xf32>
    %78 = vector.multi_reduction <maximumf>, %77, %cst_38 [1] : vector<8x8xf32> to vector<8xf32>
    %79 = vector.shape_cast %78 : vector<8xf32> to vector<8x1xf32>
    %80 = vector.broadcast %79 : vector<8x1xf32> to vector<8x8xf32>
    %81 = arith.subf %77, %80 : vector<8x8xf32>
    %82 = math.exp %81 : vector<8x8xf32>
    %cst_39 = arith.constant dense<0.000000e+00> : vector<8xf32>
    %83 = vector.multi_reduction <add>, %82, %cst_39 [1] : vector<8x8xf32> to vector<8xf32>
    %84 = vector.shape_cast %83 : vector<8xf32> to vector<8x1xf32>
    %85 = vector.broadcast %84 : vector<8x1xf32> to vector<8x8xf32>
    %86 = arith.divf %82, %85 : vector<8x8xf32>
    %cst_40 = arith.constant dense<0.000000e+00> : vector<8x8xf32>
    %87 = tpu.matmul %86, %75, %cst_40 {dimension_numbers = #tpu.dot_dimension_numbers<[1], [0], [0], [1], [0, 0, 1, 1], [], []>} : vector<8x8xf32>, vector<8x8xf32>, vector<8x8xf32> -> vector<8x8xf32>
    %88 = tpu.concatenate %42, %57, %72, %87 in 1 : vector<8x8xf32>, vector<8x8xf32>, vector<8x8xf32>, vector<8x8xf32> -> vector<8x32xf32>
    %c0_41 = arith.constant 0 : index
    %c0_42 = arith.constant 0 : index
    %89 = vector.load %arg11[%c0_41, %c0_42] : memref<32x32xf32, #tpu.memory_space<vmem>>, vector<32x32xf32>
    %cst_43 = arith.constant dense<0.000000e+00> : vector<8x32xf32>
    %90 = tpu.matmul %88, %89, %cst_43 {dimension_numbers = #tpu.dot_dimension_numbers<[1], [0], [0], [1], [0, 0, 1, 1], [], []>} : vector<8x32xf32>, vector<32x32xf32>, vector<8x32xf32> -> vector<8x32xf32>
    %c0_44 = arith.constant 0 : index
    %c0_45 = arith.constant 0 : index
    %91 = vector.load %arg12[%c0_44, %c0_45] : memref<1x32xf32, #tpu.memory_space<vmem>>, vector<1x32xf32>
    %92 = vector.broadcast %91 : vector<1x32xf32> to vector<8x32xf32>
    %93 = arith.addf %90, %92 : vector<8x32xf32>
    %c0_46 = arith.constant 0 : index
    %c0_47 = arith.constant 0 : index
    %94 = vector.load %arg13[%c0_46, %c0_47] : memref<8x32xf32, #tpu.memory_space<vmem>>, vector<8x32xf32>
    tpu.vector_store %arg13[%c0_46, %c0_47], %93 {strides = array<i32>} : memref<8x32xf32, #tpu.memory_space<vmem>>, vector<8x32xf32>,
    return
  }
  func.func @transform_0(%arg0: i32) -> (i32, i32) {
    %c0_i32 = arith.constant 0 : i32
    %c0_i32_0 = arith.constant 0 : i32
    return %arg0, %c0_i32 : i32, i32
  }
  func.func @transform_1(%arg0: i32) -> (i32, i32) {
    %c0_i32 = arith.constant 0 : i32
    %c0_i32_0 = arith.constant 0 : i32
    return %arg0, %c0_i32 : i32, i32
  }
  func.func @transform_2(%arg0: i32) -> (i32, i32) {
    %c0_i32 = arith.constant 0 : i32
    %c0_i32_0 = arith.constant 0 : i32
    return %arg0, %c0_i32 : i32, i32
  }
  func.func @transform_3(%arg0: i32) -> (i32, i32, i32) {
    %c0_i32 = arith.constant 0 : i32
    %c0_i32_0 = arith.constant 0 : i32
    %c0_i32_1 = arith.constant 0 : i32
    return %arg0, %c0_i32, %c0_i32_0 : i32, i32, i32
  }
  func.func @transform_4(%arg0: i32) -> (i32, i32) {
    %c0_i32 = arith.constant 0 : i32
    %c0_i32_0 = arith.constant 0 : i32
    %c0_i32_1 = arith.constant 0 : i32
    return %c0_i32, %c0_i32_0 : i32, i32
  }
  func.func @transform_5(%arg0: i32) -> (i32, i32) {
    %c0_i32 = arith.constant 0 : i32
    %c0_i32_0 = arith.constant 0 : i32
    %c0_i32_1 = arith.constant 0 : i32
    return %c0_i32, %c0_i32_0 : i32, i32
  }
  func.func @transform_6(%arg0: i32) -> (i32, i32) {
    %c0_i32 = arith.constant 0 : i32
    %c0_i32_0 = arith.constant 0 : i32
    %c0_i32_1 = arith.constant 0 : i32
    return %c0_i32, %c0_i32_0 : i32, i32
  }
  func.func @transform_7(%arg0: i32) -> (i32, i32) {
    %c0_i32 = arith.constant 0 : i32
    %c0_i32_0 = arith.constant 0 : i32
    %c0_i32_1 = arith.constant 0 : i32
    return %c0_i32, %c0_i32_0 : i32, i32
  }
  func.func @transform_8(%arg0: i32) -> (i32, i32) {
    %c0_i32 = arith.constant 0 : i32
    %c0_i32_0 = arith.constant 0 : i32
    %c0_i32_1 = arith.constant 0 : i32
    return %c0_i32, %c0_i32_0 : i32, i32
  }
  func.func @transform_9(%arg0: i32) -> (i32, i32) {
    %c0_i32 = arith.constant 0 : i32
    %c0_i32_0 = arith.constant 0 : i32
    %c0_i32_1 = arith.constant 0 : i32
    return %c0_i32, %c0_i32_0 : i32, i32
  }
  func.func @transform_10(%arg0: i32) -> (i32, i32) {
    %c0_i32 = arith.constant 0 : i32
    %c0_i32_0 = arith.constant 0 : i32
    %c0_i32_1 = arith.constant 0 : i32
    return %c0_i32, %c0_i32_0 : i32, i32
  }
  func.func @transform_11(%arg0: i32) -> (i32, i32) {
    %c0_i32 = arith.constant 0 : i32
    %c0_i32_0 = arith.constant 0 : i32
    %c0_i32_1 = arith.constant 0 : i32
    return %c0_i32, %c0_i32_0 : i32, i32
  }
  func.func @transform_12(%arg0: i32) -> (i32, i32) {
    %c0_i32 = arith.constant 0 : i32
    %c0_i32_0 = arith.constant 0 : i32
    return %arg0, %c0_i32 : i32, i32
  }
}

</mosaic_0001>

<bundles_post_ra>
// kernel: tpu_custom_call.1
= control target key start
LH: loop header
LB: loop body
LE: loop exit
PB: predicated region body
PF: predicated region fallthrough
CT: control target
= control target key end

     0   :  { %s3018_s0 = inlined_call_operand.hbm [shape: f32[16,32], index: 0, kind: input, shape index: {}]   ;;  %s3019_s1 = inlined_call_operand.hbm [shape: f32[16,32], index: 1, kind: input, shape index: {}]   ;;  %s3020_s2 = inlined_call_operand.hbm [shape: f32[16,32], index: 2, kind: input, shape index: {}]   ;;  %s3021_s3 = inlined_call_operand.vmem [shape: s8[2,8,8], index: 3, kind: input, shape index: {}]   ;;  %s3022_s4 = inlined_call_operand.hbm [shape: f32[32,32], index: 4, kind: input, shape index: {}]   ;;  %s3023_s5 = inlined_call_operand.vmem [shape: f32[1,32], index: 5, kind: input, shape index: {}]   ;;  %s3024_s6 = inlined_call_operand.hbm [shape: f32[32,32], index: 6, kind: input, shape index: {}]   ;;  %s3025_s7 = inlined_call_operand.hbm [shape: f32[1,32], index: 7, kind: input, shape index: {}]   ;;  %s3026_s8 = inlined_call_operand.hbm [shape: f32[32,32], index: 8, kind: input, shape index: {}]   ;;  %s3027_s9 = inlined_call_operand.hbm [shape: f32[1,32], index: 9, kind: input, shape index: {}]   ;;  %s3028_s10 = inlined_call_operand.vmem [shape: f32[32,32], index: 10, kind: input, shape index: {}]   ;;  %s3029_s11 = inlined_call_operand.vmem [shape: f32[1,32], index: 11, kind: input, shape index: {}]   ;;  %s3030_s12 = inlined_call_operand.hbm [shape: f32[16,32], index: 12, kind: output, shape index: {}]  }
   0x1   :  { %3059 = sst [smem:[#allocation30_spill]] %s3019_s1 }
   0x2   :  { %3060 = sst [smem:[#allocation31_spill]] %s3021_s3 }
   0x3   :  { %3061 = sst [smem:[#allocation32_spill]] %s3022_s4 }
   0x4   :  { %3062 = sst [smem:[#allocation33_spill]] %s3023_s5 }
   0x5   :  { %3063 = sst [smem:[#allocation34_spill]] %s3025_s7 }
   0x6   :  { %3064 = sst [smem:[#allocation35_spill]] %s3028_s10 }
   0x7   :  { %3065 = sst [smem:[#allocation36_spill]] %s3029_s11 }
   0x8   :  { %3066 = sst [smem:[#allocation37_spill]] %s3030_s12 }
   0x9   :  { %17 = vsyncpa [#allocation3], 0 }
   0xa   :  { %19 = vsyncpa [#allocation3 + $0x1], 0 }
   0xb   :  { %20 = vsyncpa [#allocation6], 0 }
   0xc   :  { %22 = vsyncpa [#allocation6 + $0x1], 0 }
   0xd   :  { %23 = vsyncpa [#allocation9], 0 }
   0xe   :  { %24 = vsyncpa [#allocation12], 0 }
   0xf   :  { %25 = vsyncpa [#allocation15], 0 }
  0x10   :  { %26 = vsyncpa [#allocation4], 0 }
  0x11   :  { %28 = vsyncpa [#allocation4 + $0x1], 0  ;;  %s2521_s21 = smov 0   ;;  %s2523_s22 = smov 0  }
  0x12   :  { %s2525_s23 = smov 0   ;;  %s2527_s24 = smov 0  }
  0x13 LB: > { %3067 = sst [smem:[#allocation23_spill]] %s2421_s21  ;;  %s2435_s25 = smov [#allocation8]   ;;  %s2433_s24 = sphi %s2527_s24, %s3114_s24   ;;  %s2429_s23 = sphi %s2525_s23, %s3118_s23   ;;  %s2425_s22 = sphi %s2523_s22, %s3117_s22   ;;  %s2421_s21 = sphi %s2521_s21, %s3116_s21  }
  0x14   : > { %3068 = sst [smem:[#allocation24_spill]] %s2433_s24  ;;  %s349_s26 = sshll.u32 %s2435_s25, 4  ;;  %s2547_s26 = int_to_ptr.vmem [resolvable:$true] %s349_s26 }
  0x15   : > { %s2542_s27 = sadd.s32 4294967295, %s2433_s24   ;;  %p1794_p0 = scmp.ge.s32.totalorder %s2433_s24, 1 }
  0x16   : > { %3069 = sst [smem:[#allocation25_spill]] %s2542_s27  ;;  %p3044_p1 = scmp.eq.s32.totalorder %s2542_s27, 0 }
  0x17   : > { %p337_p2 = scmp.lt.s32.totalorder %s2433_s24, 3  ;;  %s2436_s29 = smov [#allocation11]  }
  0x18   : > { %s379_s30 = sshll.u32 %s2436_s29, 4  ;;  %s3072_s4 = sld [smem:[#allocation32_spill]]  ;;  %s2562_s30 = int_to_ptr.vmem [resolvable:$true] %s379_s30 }
  0x19   : > { %p2549_p3 = pnand %p1794_p0, %p337_p2 }
  0x1b   : > { %s3070_s28 = scalar_select %p2549_p3, 1, 0 }
  0x1c   : > { %p2014_p5 = pneg %p2549_p3 }
  0x1e   : > { %p2558_p6 = pnand %p2014_p5, %p3044_p1  ;;  %s2121_s16 = scalar_lea.hbm %s3072_s4, 512 }
  0x1f   : > { %p2122_p7 = scmp.ne.s32.totalorder %s3072_s4, %s2121_s16  ;;  %p2128_p11 = scmp.lt.u32.totalorder %s2121_s16, %s3072_s4 }
  0x20   : > { %s3071_s13 = scalar_select %p2558_p6, 1, 0 }
  0x21   : > { %p2572_p8 = pneg %p2558_p6 }
  0x23   : > { %s3073_s19 = scalar_select %p2572_p8, 1, 0 }
  0x24   : > { %p2124_p9 = pnand %p2572_p8, %p2122_p7 }
  0x26   : > { %p2125_p10 = pneg %p2124_p9 }
  0x28   : > { %p2130_p12 = pnand %p2128_p11, %p2125_p10 }
  0x2a   : > { %2133 = shalt.err (!%p2130_p12)
}
  0x2b   : > { %s2134_s29 = scalar_lea.vmem %s2547_s26, 512  ;;  %p2142_p5 = scmp.lt.s32.totalorder %s2547_s26, %s2547_s26 }
  0x2c   : > { %p2135_p13 = scmp.ne.s32.totalorder %s2547_s26, %s2134_s29  ;;  %p2143_p4 = scmp.lt.s32.totalorder %s2134_s29, %s2134_s29 }
  0x2e   : > { %p2137_p0 = pnand %p2135_p13, %p2572_p8  ;;  %p2144_p7 = por %p2143_p4, %p2142_p5 }
  0x30   : > { %p2138_p2 = pneg %p2137_p0 }
  0x32   : > { %p2145_p9 = pnand %p2144_p7, %p2138_p2 }
  0x34   : > { %2148 = shalt.err (!%p2145_p9)
}
  0x35   : > { %s3034_s14 = smov 128   ;;  %s3036_s15 = smov 8  }
  0x36   : > { %2017 = dma.hbm_to_vmem [thread:$0]  (!%p2558_p6), %s3072_s4, 512, %s2547_s26, [#allocation9], %s3034_s14, %s3034_s14, %s3036_s15  }
  0x37   : > { %s3074_s7 = sld [smem:[#allocation34_spill]] }
  0x3d   : > { %s2149_s25 = scalar_lea.hbm %s3074_s7, 16 }
  0x3e   : > { %p2150_p4 = scmp.ne.s32.totalorder %s3074_s7, %s2149_s25  ;;  %p2156_p12 = scmp.lt.u32.totalorder %s2149_s25, %s3074_s7 }
  0x40   : > { %p2152_p10 = pnand %p2150_p4, %p2572_p8 }
  0x42   : > { %p2153_p11 = pneg %p2152_p10 }
  0x44   : > { %p2158_p13 = pnand %p2156_p12, %p2153_p11 }
  0x46   : > { %2161 = shalt.err (!%p2158_p13)
}
  0x47   : > { %s2162_s26 = scalar_lea.vmem %s2562_s30, 16  ;;  %s2169_s12 = scalar_lea.vmem %s2562_s30, 32 }
  0x48   : > { %p2163_p0 = scmp.ne.s32.totalorder %s2562_s30, %s2162_s26  ;;  %p2170_p7 = scmp.lt.s32.totalorder %s2562_s30, %s2562_s30 }
  0x49   : > { %p2171_p9 = scmp.lt.s32.totalorder %s2169_s12, %s2162_s26 }
  0x4a   : > { %p2165_p2 = pnand %p2163_p0, %p2572_p8 }
  0x4b   : > { %p2172_p4 = por %p2171_p9, %p2170_p7 }
  0x4c   : > { %p2166_p5 = pneg %p2165_p2 }
  0x4e   : > { %p2173_p10 = pnand %p2172_p4, %p2166_p5 }
  0x50   : > { %2176 = shalt.err (!%p2173_p10)
}
  0x51   : > { %2023 = dma.hbm_to_vmem [thread:$0]  (!%p2558_p6), %s3074_s7, 16, %s2562_s30, [#allocation12]  }
  0x52   : > { %s1793_s16 = sadd.s32 4294967294, %s2433_s24   ;;  %s2622_s17 = sadd.s32 1, %s2433_s24  }
  0x53   : > { %3075 = sst [smem:[#allocation26_spill]] %s2622_s17  ;;  %s38_s18 = ssub.s32 %s2433_s24, %s2622_s17 }
  0x54   : > { %s41_s20 = sadd.s32 1, %s2429_s23  ;;  %p39_p11 = scmp.eq.s32.totalorder %s38_s18, 0 }
  0x55   : > { %p48_p12 = scmp.ne.s32.totalorder %s2429_s23, %s2425_s22  ;;  %p49_p13 = scmp.eq.s32.totalorder %s2433_s24, 0 }
  0x56   : > { %p54_p0 = scmp.ne.s32.totalorder %s2425_s22, %s2421_s21  ;;  %p324_p7 = scmp.eq.s32.totalorder %s2542_s27, 1 }
  0x57   : > { %s2633_s25 = scalar_select %p39_p11, %s2429_s23, %s41_s20  }
  0x58   : > { %p50_p2 = por %p49_p13, %p48_p12  ;;  %p2637_p5 = por %p3044_p1, %p54_p0 }
  0x59   : > { %3076 = sst [smem:[#allocation27_spill]] %s2633_s25  ;;  %p330_p9 = scmp.eq.s32.totalorder %s1793_s16, 1 }
  0x5a   : > { %s3077_s29 = scalar_select %p2637_p5, 1, 0 }
  0x5b   : > { %p2049_p4 = scmp.lt.s32.totalorder %s2433_s24, 2  ;;  %s3038_s30 = sand.u32 1, %s2429_s23  }
  0x5c   : > { %p2644_p10 = por %p324_p7, %p48_p12  ;;  %p2648_p3 = por %p330_p9, %p54_p0 }
  0x5d   : > { %s2654_s10 = sshll.u32 %s3038_s30, 3  ;;  %s2657_s11 = sshll.u32 %s2433_s24, 7 }
  0x5e   : > { %s3078_s26 = scalar_select %p2644_p10, 1, 0 }
  0x5f   : > { %s3080_s12 = scalar_select %p2648_p3, 1, 0 }
  0x60   : > { %3079 = sst [smem:[#allocation28_spill]] %s3078_s26  ;;  %p2659_p11 = pnand %p2049_p4, %p50_p2 }
  0x61   : > { %3081 = sst [smem:[#allocation29_spill]] %s3080_s12  ;;  %s438_s16 = sand.u32 1, %s2433_s24  }
  0x62   : > { %s3082_s18 = scalar_select %p2659_p11, 1, 0 }
  0x63   : > { %s3083_s1 = sld [smem:[#allocation30_spill]]  ;;  %s442_s30 = scalar_lea.vmem [#allocation5], %s2654_s10 }
  0x64   : > { %s449_s4 = sshll.u32 %s442_s30, 4  ;;  %s2439_s7 = smov [#allocation10]   ;;  %s2671_s4 = int_to_ptr.vmem [resolvable:$true] %s449_s4 }
  0x65   : > { %s2673_s25 = sshll.u32 %s2439_s7, 4  ;;  %s2675_s17 = scalar_lea.sflag [#allocation6], %s438_s16  ;;  %s366_s25 = int_to_ptr.vmem [resolvable:$true] %s2673_s25 }
  0x66   : > { %p2681_p13 = pneg %p2659_p11 }
  0x68   : > { %s3084_s14 = scalar_select %p2681_p13, 1, 0 }
  0x69   : > { %s2668_s15 = scalar_lea.hbm %s3083_s1, %s2657_s11  ;;  %s2182_s24 = scalar_lea.hbm %s3083_s1, 256 }
  0x6a   : > { %s2177_s12 = scalar_lea.hbm %s2668_s15, 128  ;;  %p2183_p7 = scmp.lt.u32.totalorder %s2668_s15, %s3083_s1 }
  0x6b   : > { %p2178_p12 = scmp.ne.s32.totalorder %s2668_s15, %s2177_s12  ;;  %p2184_p9 = scmp.lt.u32.totalorder %s2182_s24, %s2177_s12 }
  0x6c   : > { %p2186_p1 = scmp.lt.u32.totalorder %s2177_s12, %s2668_s15 }
  0x6d   : > { %p2180_p0 = pnand %p2681_p13, %p2178_p12  ;;  %p2185_p4 = por %p2184_p9, %p2183_p7 }
  0x6f   : > { %p2181_p2 = pneg %p2180_p0  ;;  %p2187_p3 = por %p2186_p1, %p2185_p4 }
  0x71   : > { %p2188_p10 = pnand %p2187_p3, %p2181_p2 }
  0x73   : > { %2191 = shalt.err (!%p2188_p10)
}
  0x74   : > { %s2192_s16 = scalar_lea.vmem %s2671_s4, 128  ;;  %s2440_s20 = smov [#allocation5]  }
  0x75   : > { %p2193_p12 = scmp.ne.s32.totalorder %s2671_s4, %s2192_s16  ;;  %s2197_s30 = sshll.u32 %s2440_s20, 4  ;;  %s2198_s30 = int_to_ptr.vmem [resolvable:$false] %s2197_s30 }
  0x76   : > { %s2199_s21 = scalar_lea.vmem %s2198_s30, 256  ;;  %p2200_p6 = scmp.lt.s32.totalorder %s2671_s4, %s2198_s30 }
  0x77   : > { %p2195_p0 = pnand %p2193_p12, %p2681_p13  ;;  %p2201_p8 = scmp.lt.s32.totalorder %s2199_s21, %s2192_s16 }
  0x79   : > { %p2196_p5 = pneg %p2195_p0  ;;  %p2202_p7 = por %p2201_p8, %p2200_p6 }
  0x7b   : > { %p2203_p9 = pnand %p2202_p7, %p2196_p5 }
  0x7d   : > { %2206 = shalt.err (!%p2203_p9)
}
  0x7e   : > { %2036 = dma.hbm_to_vmem [thread:$0]  (!%p2659_p11), %s2668_s15, 128, %s2671_s4, %s2675_s17  }
  0x7f   : > { %s2207_s7 = scalar_lea.hbm %s3024_s6, 512  ;;  %p3085_p3 = scmp.ne.s32.totalorder %s3073_s19, 0 }
  0x80   : > { %p2208_p1 = scmp.ne.s32.totalorder %s3024_s6, %s2207_s7  ;;  %p2214_p5 = scmp.lt.u32.totalorder %s2207_s7, %s3024_s6 }
  0x82   : > { %p2210_p6 = pnand %p2208_p1, %p3085_p3 }
  0x84   : > { %p2211_p8 = pneg %p2210_p6 }
  0x86   : > { %p2216_p10 = pnand %p2214_p5, %p2211_p8 }
  0x88   : > { %2219 = shalt.err (!%p2216_p10)
}
  0x89   : > { %s2220_s21 = scalar_lea.vmem %s366_s25, 512  ;;  %p2228_p0 = scmp.lt.s32.totalorder %s366_s25, %s366_s25 }
  0x8a   : > { %p2221_p2 = scmp.ne.s32.totalorder %s366_s25, %s2220_s21  ;;  %p2229_p7 = scmp.lt.s32.totalorder %s2220_s21, %s2220_s21 }
  0x8c   : > { %p2223_p4 = pnand %p2221_p2, %p3085_p3  ;;  %p2230_p9 = por %p2229_p7, %p2228_p0 }
  0x8e   : > { %p2224_p12 = pneg %p2223_p4 }
  0x90   : > { %p2231_p11 = pnand %p2230_p9, %p2224_p12 }
  0x92   : > { %2234 = shalt.err (!%p2231_p11)
}
  0x93   : > { %p3086_p1 = scmp.ne.s32.totalorder %s3071_s13, 0  ;;  %s3087_s1 = smov 8  }
  0x94   : > { %s3088_s4 = smov 128   ;;  %s2441_s12 = smov [#allocation13]  }
  0x95   : > { %2020 = dma.hbm_to_vmem [thread:$0]  (!%p3086_p1), %s3024_s6, 512, %s366_s25, [#allocation9], %s3088_s4, %s3088_s4, %s3087_s1  }
  0x96   : > { %s389_s7 = sshll.u32 %s2441_s12, 4  ;;  %s2442_s20 = smov [#allocation14]   ;;  %s390_s7 = int_to_ptr.vmem [resolvable:$true] %s389_s7 }
  0x97   : > { %s403_s16 = sshll.u32 %s2442_s20, 4  ;;  %s2235_s26 = scalar_lea.hbm %s3026_s8, 512  ;;  %s404_s16 = int_to_ptr.vmem [resolvable:$true] %s403_s16 }
  0x98   : > { %p2236_p11 = scmp.ne.s32.totalorder %s3026_s8, %s2235_s26  ;;  %p2242_p5 = scmp.lt.u32.totalorder %s2235_s26, %s3026_s8 }
  0x9a   : > { %p2238_p6 = pnand %p2236_p11, %p3085_p3 }
  0x9c   : > { %p2239_p8 = pneg %p2238_p6 }
  0x9e   : > { %p2244_p10 = pnand %p2242_p5, %p2239_p8 }
  0xa0   : > { %2247 = shalt.err (!%p2244_p10)
}
  0xa1   : > { %s2248_s25 = scalar_lea.vmem %s390_s7, 512  ;;  %p2256_p0 = scmp.lt.s32.totalorder %s390_s7, %s390_s7 }
  0xa2   : > { %p2249_p2 = scmp.ne.s32.totalorder %s390_s7, %s2248_s25  ;;  %p2257_p7 = scmp.lt.s32.totalorder %s2248_s25, %s2248_s25 }
  0xa4   : > { %p2251_p4 = pnand %p2249_p2, %p3085_p3  ;;  %p2258_p9 = por %p2257_p7, %p2256_p0 }
  0xa6   : > { %p2252_p12 = pneg %p2251_p4 }
  0xa8   : > { %p2259_p13 = pnand %p2258_p9, %p2252_p12 }
  0xaa   : > { %2262 = shalt.err (!%p2259_p13)
}
  0xab   : > { %2026 = dma.hbm_to_vmem [thread:$0]  (!%p3086_p1), %s3026_s8, 512, %s390_s7, [#allocation12], %s3088_s4, %s3088_s4, %s3087_s1  }
  0xac   : > { %s2263_s24 = scalar_lea.hbm %s3027_s9, 16 }
  0xad   : > { %p2264_p11 = scmp.ne.s32.totalorder %s3027_s9, %s2263_s24  ;;  %p2270_p8 = scmp.lt.u32.totalorder %s2263_s24, %s3027_s9 }
  0xaf   : > { %p2266_p13 = pnand %p2264_p11, %p3085_p3 }
  0xb1   : > { %p2267_p6 = pneg %p2266_p13 }
  0xb3   : > { %p2272_p5 = pnand %p2270_p8, %p2267_p6 }
  0xb5   : > { %2275 = shalt.err (!%p2272_p5)
}
  0xb6   : > { %s2276_s15 = scalar_lea.vmem %s404_s16, 16  ;;  %s2283_s1 = scalar_lea.vmem %s404_s16, 32 }
  0xb7   : > { %p2277_p10 = scmp.ne.s32.totalorder %s404_s16, %s2276_s15  ;;  %p2284_p12 = scmp.lt.s32.totalorder %s404_s16, %s404_s16 }
  0xb8   : > { %p2285_p0 = scmp.lt.s32.totalorder %s2283_s1, %s2276_s15 }
  0xb9   : > { %p2279_p2 = pnand %p2277_p10, %p3085_p3 }
  0xba   : > { %p2286_p7 = por %p2285_p0, %p2284_p12 }
  0xbb   : > { %p2280_p4 = pneg %p2279_p2 }
  0xbd   : > { %p2287_p9 = pnand %p2286_p7, %p2280_p4 }
  0xbf   : > { %2290 = shalt.err (!%p2287_p9)
}
  0xc0   : > { %2029 = dma.hbm_to_vmem [thread:$0]  (!%p3086_p1), %s3027_s9, 16, %s404_s16, [#allocation15]  }
  0xc1   : > { %s2770_s3 = scalar_lea.hbm %s3018_s0, %s2657_s11  ;;  %s424_s5 = scalar_lea.vmem [#allocation2], %s2654_s10 }
  0xc2   : > { %s431_s13 = sshll.u32 %s424_s5, 4  ;;  %s2779_s24 = scalar_lea.hbm %s3020_s2, %s2657_s11  ;;  %s2773_s13 = int_to_ptr.vmem [resolvable:$true] %s431_s13 }
  0xc3   : > { %s3089_s12 = sand.u32 1, %s2429_s23   ;;  %s2291_s20 = scalar_lea.hbm %s2770_s3, 128 }
  0xc4   : > { %s421_s16 = scalar_lea.sflag [#allocation3], %s3089_s12  ;;  %p2292_p3 = scmp.ne.s32.totalorder %s2770_s3, %s2291_s20 }
  0xc5   : > { %p3090_p1 = scmp.ne.s32.totalorder %s3084_s14, 0  ;;  %s2296_s15 = scalar_lea.hbm %s3018_s0, 256 }
  0xc6   : > { %p2297_p6 = scmp.lt.u32.totalorder %s2770_s3, %s3018_s0  ;;  %p2298_p8 = scmp.lt.u32.totalorder %s2296_s15, %s2291_s20 }
  0xc7   : > { %p2294_p11 = pnand %p2292_p3, %p3090_p1  ;;  %p2300_p10 = scmp.lt.u32.totalorder %s2291_s20, %s2770_s3 }
  0xc8   : > { %p2299_p5 = por %p2298_p8, %p2297_p6 }
  0xc9   : > { %p2295_p13 = pneg %p2294_p11 }
  0xca   : > { %p2301_p2 = por %p2300_p10, %p2299_p5 }
  0xcc   : > { %p2302_p4 = pnand %p2301_p2, %p2295_p13 }
  0xce   : > { %2305 = shalt.err (!%p2302_p4)
}
  0xcf   : > { %s2306_s11 = scalar_lea.vmem %s2773_s13, 128  ;;  %s2443_s7 = smov [#allocation2]  }
  0xd0   : > { %p2307_p12 = scmp.ne.s32.totalorder %s2773_s13, %s2306_s11  ;;  %s2311_s19 = sshll.u32 %s2443_s7, 4  ;;  %s2312_s19 = int_to_ptr.vmem [resolvable:$false] %s2311_s19 }
  0xd1   : > { %s2313_s25 = scalar_lea.vmem %s2312_s19, 256  ;;  %p2314_p9 = scmp.lt.s32.totalorder %s2773_s13, %s2312_s19 }
  0xd2   : > { %p2309_p0 = pnand %p2307_p12, %p3090_p1  ;;  %p2315_p3 = scmp.lt.s32.totalorder %s2313_s25, %s2306_s11 }
  0xd4   : > { %p2310_p7 = pneg %p2309_p0  ;;  %p2316_p11 = por %p2315_p3, %p2314_p9 }
  0xd6   : > { %p2317_p6 = pnand %p2316_p11, %p2310_p7 }
  0xd8   : > { %2320 = shalt.err (!%p2317_p6)
}
  0xd9   : > { %p3091_p13 = scmp.ne.s32.totalorder %s3082_s18, 0  ;;  %s460_s5 = scalar_lea.vmem [#allocation7], %s2654_s10 }
  0xda   : > { %s467_s27 = sshll.u32 %s460_s5, 4  ;;  %s2321_s26 = scalar_lea.hbm %s2779_s24, 128  ;;  %s468_s27 = int_to_ptr.vmem [resolvable:$true] %s467_s27 }
  0xdb   : > { %2033 = dma.hbm_to_vmem [thread:$0]  (!%p3091_p13), %s2770_s3, 128, %s2773_s13, %s421_s16  }
  0xdc   : > { %p2322_p8 = scmp.ne.s32.totalorder %s2779_s24, %s2321_s26  ;;  %s2326_s30 = scalar_lea.hbm %s3020_s2, 256 }
  0xdd   : > { %p2327_p2 = scmp.lt.u32.totalorder %s2779_s24, %s3020_s2  ;;  %p2328_p4 = scmp.lt.u32.totalorder %s2326_s30, %s2321_s26 }
  0xde   : > { %p2324_p5 = pnand %p2322_p8, %p3090_p1  ;;  %p2330_p0 = scmp.lt.u32.totalorder %s2321_s26, %s2779_s24 }
  0xdf   : > { %p2329_p12 = por %p2328_p4, %p2327_p2 }
  0xe0   : > { %p2325_p10 = pneg %p2324_p5 }
  0xe1   : > { %p2331_p7 = por %p2330_p0, %p2329_p12 }
  0xe3   : > { %p2332_p9 = pnand %p2331_p7, %p2325_p10 }
  0xe5   : > { %2335 = shalt.err (!%p2332_p9)
}
  0xe6   : > { %s2336_s10 = scalar_lea.vmem %s468_s27, 128  ;;  %s2444_s3 = smov [#allocation7]  }
  0xe7   : > { %p2337_p3 = scmp.ne.s32.totalorder %s468_s27, %s2336_s10  ;;  %s2341_s13 = sshll.u32 %s2444_s3, 4  ;;  %s2342_s13 = int_to_ptr.vmem [resolvable:$false] %s2341_s13 }
  0xe8   : > { %s2343_s16 = scalar_lea.vmem %s2342_s13, 256  ;;  %p2344_p8 = scmp.lt.s32.totalorder %s468_s27, %s2342_s13 }
  0xe9   : > { %p2339_p11 = pnand %p2337_p3, %p3090_p1  ;;  %p2345_p5 = scmp.lt.s32.totalorder %s2343_s16, %s2336_s10 }
  0xeb   : > { %p2340_p6 = pneg %p2339_p11  ;;  %p2346_p13 = por %p2345_p5, %p2344_p8 }
  0xed   : > { %p2347_p2 = pnand %p2346_p13, %p2340_p6 }
  0xef   : > { %2350 = shalt.err (!%p2347_p2)
}
  0xf0   : > { %p3092_p4 = scmp.ne.s32.totalorder %s3082_s18, 0  ;;  %p3093_p10 = scmp.ne.s32.totalorder %s3070_s28, 0 }
  0xf1   : > { %s2826_s14 = sand.u32 (!%p3093_p10), 1, %s2425_s22   ;;  %p3094_p1 = scmp.ne.s32.totalorder (!%p3093_p10), %s3077_s29, 0 }
  0xf2   : > { %2039 = dma.hbm_to_vmem [thread:$0]  (!%p3092_p4), %s2779_s24, 128, %s468_s27, %s2675_s17  }
  0xf3   : > { %483 = sbr.rel (%p3093_p10) target bundleno = 2178 (0x882), region = 68  ;;  %s2829_s1 = sshll.u32 (!%p3093_p10), %s2826_s14, 3 }
  0xf4   : > { %s486_s4 = scalar_lea.sflag (!%p3093_p10), [#allocation3], %s2826_s14  ;;  %s489_s11 = scalar_lea.vmem (!%p3093_p10), [#allocation2], %s2829_s1 }
  0xfa   : > { %2396 = dma.done.wait (%p3094_p1), %s486_s4, 128  }
  0xfb   : > { %2398 = vsyncadd (%p3094_p1), %s486_s4, 4294967168  ;;  %s3095_s17 = sld [smem:[#allocation25_spill]]  ;;  %s498_s24 = scalar_lea.vmem [#allocation5], %s2829_s1 }
 0x101   : > { %s494_s28 = sand.u32 1, %s3095_s17  }
 0x102   : > { %s495_s18 = scalar_lea.sflag [#allocation6], %s494_s28 }
 0x103   : > { %2400 = dma.done.wait (%p3094_p1), %s495_s18, 256  }
 0x104   : > { %2402 = vsyncadd (%p3094_p1), %s495_s18, 4294967040  ;;  %s507_s7 = scalar_lea.vmem [#allocation7], %s2829_s1  ;;  %p3096_p13 = scmp.eq.s32.totalorder %s3095_s17, 0 }
 0x106   : > { %2404 = dma.done.wait (%p3096_p13), [#allocation9], 1024   ;;  %p3097_p12 = pmov %p3096_p13 }
 0x108   : > { %2406 = vsyncadd (%p3097_p12), [#allocation9], 4294966272  ;;  %p3098_p0 = pmov %p3097_p12 }
 0x10a   : > { %2408 = dma.done.wait (%p3098_p0), [#allocation12], 528   ;;  %p3099_p7 = pmov %p3098_p0 }
 0x10b   : > { %p3100_p9 = pmov %p3098_p0 }
 0x10c   : > { %2410 = vsyncadd (%p3099_p7), [#allocation12], 4294966768 }
 0x10d   : > { %2412 = dma.done.wait (%p3100_p9), [#allocation15], 16   ;;  %p3101_p3 = pmov %p3098_p0 }
 0x10e   : > { %v2445_v0 = vmov 0.0|0.0   ;;  %vm2446_vm0 = vmmov 0   ;;  %v2447_v1 = vmov 0.0   ;;  %v674_v2 = vld [vmem:[#allocation10] sm:$0xff]  ;;  %v675_v3 = vld [vmem:[#allocation10 + $0x8] sm:$0xff]  ;;  %v676_v7 = vld [vmem:[#allocation10 + $0x10] sm:$0xff] }
 0x10f   : > { %2414 = vsyncadd (%p3101_p3), [#allocation15], 4294967280  ;;  %1968 = vmatprep.subr.bf16.mxu1 %v2445_v0  ;;  %1962 = vmatprep.subr.bf16.mxu0 %v2445_v0  ;;  %v587_v4 = vld [vmem:[#allocation8] sm:$0xff]  ;;  %v1969_v5 = vpack.c.bf16 %v675_v3, %v674_v2  ;;  %v588_v6 = vld [vmem:[#allocation8 + $0x8] sm:$0xff]  ;;  %vm598_vm1 = vcmask 261120   ;;  %s3102_s25 = sld [smem:[#allocation33_spill]] }
 0x110   : > { %1897 = vmatprep.mubr.msk.f32.mxu1 %vm2446_vm0, %v2447_v1  ;;  %1886 = vmatprep.mubr.msk.f32.mxu0 %vm2446_vm0, %v2447_v1  ;;  %v677_v8 = vld [vmem:[#allocation10 + $0x18] sm:$0xff]  ;;  %v1963_v9 = vpack.c.bf16 %v588_v6, %v587_v4  ;;  %v589_v10 = vld [vmem:[#allocation8 + $0x10] sm:$0xff]  ;;  %v673_v14 = vld [vmem:[%s498_s24] sm:$0xff]  ;;  %vm847_vm2 = vcmask 64512   ;;  %s2448_s5 = smov 120   ;;  %s2449_s27 = smov 112  }
 0x111   : > { %v590_v11 = vld [vmem:[#allocation8 + $0x18] sm:$0xff]  ;;  %1970 = vmatpush3.bf16.msra.mxu1 %v1969_v5  ;;  %v1972_v12 = vpack.c.bf16 %v677_v8, %v676_v7  ;;  %v1820_v16 = vld [vmem:[#allocation11] ss:$0 sm:$0xff]  ;;  %s2450_s26 = smov 104   ;;  %v759_v25 = vld [vmem:[#allocation13] sm:$0xff]  ;;  %p582_p11 = scmp.lt.s32.totalorder %s3095_s17, 1 }
 0x112   : > { %1964 = vmatpush3.bf16.msra.mxu0 %v1963_v9  ;;  %1971 = vmatprep.subr.bf16.mxu1 %v2445_v0  ;;  %v1966_v13 = vpack.c.bf16 %v590_v11, %v589_v10  ;;  %v586_v15 = vld [vmem:[%s489_s11] sm:$0xff]  ;;  %s3103_s15 = sld [smem:[#allocation31_spill]]  ;;  %v2451_v34 = vmov -1e+09   ;;  %v1822_v45 = vld [vmem:[#allocation14] ss:$0 sm:$0xff] }
 0x113   : > { %1965 = vmatprep.subr.bf16.mxu0 %v2445_v0  ;;  %v760_v26 = vld [vmem:[#allocation13 + $0x8] sm:$0xff]  ;;  %v761_v27 = vld [vmem:[#allocation13 + $0x10] sm:$0xff]  ;;  %v762_v29 = vld [vmem:[#allocation13 + $0x18] sm:$0xff]  ;;  %s583_s12 = scalar_select %p582_p11, %s3095_s17, 1  ;;  %vm1517_vm4 = vcmask 130048   ;;  %vm1519_vm5 = vcmask 195584  }
 0x114   : > { %v1975_v28 = vpack.c.bf16 %v760_v26, %v759_v25  ;;  %v1978_v30 = vpack.c.bf16 %v762_v29, %v761_v27  ;;  %v758_v31 = vld [vmem:[%s507_s7] sm:$0xff]  ;;  %s3104_s16 = sld [smem:[#allocation35_spill]]  ;;  %s2452_s29 = smov 8  }
 0x115   : > { %1973 = vmatpush3.bf16.msra.mxu1 %v1972_v12  ;;  %v1818_v17 = vld [vmem:[%s3102_s25] ss:$0 sm:$0xff]  ;;  %s1817_s20 = sshll.u32 %s583_s12, 1  ;;  %s2453_s19 = smov 16  }
 0x116   : > { %1967 = vmatpush3.bf16.msra.mxu0 %v1966_v13  ;;  %1911 = vmatprep.subr.mxu1 %v2447_v1  ;;  %s2454_s25 = smov 24   ;;  %s3106_s12 = sld [smem:[#allocation36_spill]] }
 0x117   : > { %1974 = vmatprep.subr.bf16.mxu0 %v2445_v0  ;;  %s581_s30 = scalar_lea.vmem [#allocation16], %s2829_s1  ;;  %s3107_s3 = sld [smem:[#allocation37_spill]] }
 0x118   : > { %1898 = vmatmul.mubr.msk.f32.vlgmr.msra.gmra.mrb[0].mxu1 %vm598_vm1, %v673_v14  ;;  %s585_s10 = scalar_lea.vmem %s3103_s15, %s1817_s20  ;;  %s1839_s20 = sshll.u32 %s3095_s17, 7 }
 0x119   : > { %1887 = vmatmul.mubr.msk.f32.vlgmr.msra.gmra.mrb[0].mxu0 %vm598_vm1, %v586_v15  ;;  %1913 = vmatprep.mubr.msk.f32.mxu1 %vm2446_vm0, %v2447_v1  ;;  %v843_v32 = vld [vmem:[%s585_s10] sm:$0x3]  ;;  %s1620_s21 = sshll.u32 %s581_s30, 4  ;;  %s1607_s4 = scalar_lea.sflag [#allocation4], %s2826_s14  ;;  %s2975_s21 = int_to_ptr.vmem [resolvable:$true] %s1620_s21 }
 0x11a   : > { %1908 = vmatprep.mubr.msk.f32.mxu0 %vm2446_vm0, %v2447_v1  ;;  %1976 = vmatpush3.bf16.msra.mxu0 %v1975_v28  ;;  %v844_v33 = vunpack.c.0.s8 %v843_v32  ;;  %s2351_s11 = scalar_lea.vmem %s2975_s21, 128  ;;  %s2455_s1 = smov [#allocation16]  }
 0x11b   : > { %1977 = vmatprep.subr.bf16.mxu0 %v2445_v0  ;;  %p2352_p6 = scmp.ne.s32.totalorder %s2975_s21, %s2351_s11  ;;  %s2355_s17 = sshll.u32 %s2455_s1, 4  ;;  %s2356_s17 = int_to_ptr.vmem [resolvable:$false] %s2355_s17 }
 0x11c   : > { %vm845_vm3 = vcmp.ne.s32.totalorder %v844_v33, 0  ;;  %s2357_s28 = scalar_lea.vmem %s2356_s17, 256  ;;  %p2358_p4 = scmp.lt.s32.totalorder %s2975_s21, %s2356_s17 }
 0x11d   : > { %v846_v35 = vsel %vm845_vm3, 0.0, %v2451_v34  ;;  %s2973_s13 = scalar_lea.hbm %s3107_s3, %s1839_s20  ;;  %p2359_p10 = scmp.lt.s32.totalorder %s2357_s28, %s2351_s11 }
 0x11e   : > { %1979 = vmatpush3.bf16.msra.mxu0 %v1978_v30 }
 0x11f   : > { %1931 = vmatprep.subr.mxu0 %v2447_v1  ;;  %p2360_p1 = por %p2359_p10, %p2358_p4 }
 0x121   : > { %1909 = vmatmul.mubr.msk.f32.vlgmr.msra.gmra.mrb[2].mxu0 %vm598_vm1, %v758_v31 }
 0x122   : > { %1933 = vmatprep.mubr.msk.f32.mxu0 %vm2446_vm0, %v2447_v1 }
 0x1eb   : > { %v754_v18 = vpop.f32.mrb[0].mxu1 }
 0x1ec   : > { %v755_v19 = vadd.f32 %v1820_v16, %v754_v18  ;;  %v668_v20 = vpop.f32.mrb[0].mxu0  ;;  %v1899_v21 = vpop.f32.mrb[1].mxu1 }
 0x1ed   : > { %v669_v22 = vadd.f32 %v1818_v17, %v668_v20  ;;  %v1888_v23 = vpop.f32.mrb[1].mxu0 }
 0x1ee   : > { %1010 = vrot.lane.b32.xlu1 %v755_v19, %s2448_s5  ;;  %1912 = vmatpush3.xpose.msk.msra.mxu1 %vm847_vm2, %v755_v19 }
 0x1ef   : > { %v672_v24 = vmul.f32 0.35355338, %v669_v22  ;;  %1916 = vmatprep.subr.mxu1 %v2447_v1 }
 0x1f1   : > { %1914 = vmatmul.mubr.msk.f32.vlgmr.msra.gmra.mrb[2].mxu1 %vm847_vm2, %v672_v24 }
 0x1f2   : > { %1008 = vrot.lane.b32.xlu1 %v672_v24, %s2448_s5  ;;  %1918 = vmatprep.mubr.msk.f32.mxu1 %vm2446_vm0, %v2447_v1 }
 0x1f4   : > { %v839_v46 = vpop.f32.mrb[2].mxu0 }
 0x1f5   : > { %v2903_v47 = vadd.f32 %v1822_v45, %v839_v46  ;;  %v1910_v48 = vpop.f32.mrb[3].mxu0 }
 0x1f6   : > { %1174 = vrot.lane.b32.xlu1 %v672_v24, %s2449_s27 }
 0x1f7   : > { %1917 = vmatpush3.msra.mxu1 %v2903_v47 }
 0x1f8   : > { %1921 = vmatprep.subr.mxu1 %v2447_v1 }
 0x1fa   : > { %1341 = vrot.lane.b32.xlu1 %v755_v19, %s2450_s26 }
 0x1fe   : > { %1339 = vrot.lane.b32.xlu1 %v672_v24, %s2450_s26 }
 0x260   : > { %v1011_v49 = vpop.permute.xlu1 %1010 }
 0x264   : > { %v1009_v50 = vpop.permute.xlu1 %1008 }
 0x268   : > { %v1175_v51 = vpop.permute.xlu1 %1174 }
 0x26c   : > { %v1342_v54 = vpop.permute.xlu1 %1341 }
 0x270   : > { %v1340_v56 = vpop.permute.xlu1 %1339 }
 0x2c4   : > { %v920_v36 = vpop.f32.mrb[2].mxu1 }
 0x2c5   : > { %v921_v37 = vadd.f32 %v920_v36, %v846_v35  ;;  %v1915_v38 = vpop.f32.mrb[3].mxu1 }
 0x2c6   : > { %v1522_v38 = vld [vmem:[%s3104_s16 + $0x8] sm:$0xff] }
 0x2c7   : > { %v924_v39 = vsel %vm847_vm2, %v921_v37, -inf }
 0x2c8   : > { %925 = vmax.xlane.f32.xlu0 %v924_v39 }
 0x355   : > { %v926_v40 = vpop.xlane.xlu0 %925 }
 0x356   : > { %v927_v41 = vsub.f32 %v921_v37, %v926_v40  ;;  %v1521_v37 = vld [vmem:[%s3104_s16] sm:$0xff]  ;;  %v1523_v40 = vld [vmem:[%s3104_s16 + $0x10] sm:$0xff] }
 0x357   : > { %v1981_v39 = vpack.c.bf16 %v1522_v38, %v1521_v37 }
 0x358   : > { %v928_v42 = vmul.f32 1.442695, %v927_v41 }
 0x35a   : > { %2105 = vpow2.f32 %v928_v42 }
 0x364   : > { %v2106_v43 = vpop.eup %2105 }
 0x365   : > { %v930_v44 = vsel %vm847_vm2, %v2106_v43, 0.0 }
 0x366   : > { %931 = vadd.xlane.f32.xlu0 %v930_v44 }
 0x37c   : > { %1176 = vrot.lane.b32.xlu0 %v755_v19, %s2449_s27 }
 0x3f3   : > { %v932_v52 = vpop.xlane.xlu0 %931 }
 0x3f4   : > { %2107 = vrcp.f32 %v932_v52 }
 0x3f7   : > { %v1177_v53 = vpop.permute.xlu0 %1176 }
 0x3f8   : > { %1932 = vmatpush3.xpose.msk.msra.mxu0 %vm847_vm2, %v1177_v53  ;;  %v1836_v53 = vld [vmem:[%s3106_s12] ss:$0 sm:$0xff] }
 0x3f9   : > { %1941 = vmatprep.subr.mxu0 %v2447_v1 }
 0x3fb   : > { %1934 = vmatmul.mubr.msk.f32.vlgmr.msra.gmra.mrb[4].mxu0 %vm847_vm2, %v1175_v51 }
 0x3fc   : > { %1942 = vmatpush3.xpose.msk.msra.mxu0 %vm847_vm2, %v1342_v54  ;;  %1943 = vmatprep.mubr.msk.f32.mxu0 %vm2446_vm0, %v2447_v1 }
 0x3fd   : > { %1980 = vmatprep.subr.bf16.mxu0 %v2445_v0 }
 0x3fe   : > { %v2108_v55 = vpop.eup %2107 }
 0x3ff   : > { %v934_v57 = vmul.f32 %v2108_v55, %v2106_v43  ;;  %1944 = vmatmul.mubr.msk.f32.vlgmr.msra.gmra.mrb[6].mxu0 %vm847_vm2, %v1340_v56 }
 0x400   : > { %1959 = vmatprep.mubr.msk.f32.mxu0 %vm2446_vm0, %v2447_v1  ;;  %1982 = vmatpush3.bf16.msra.mxu0 %v1981_v39 }
 0x401   : > { %1919 = vmatmul.mubr.msk.f32.vlgmr.msra.gmra.mrb[4].mxu1 %vm847_vm2, %v934_v57  ;;  %1983 = vmatprep.subr.bf16.mxu0 %v2445_v0 }
 0x402   : > { %1922 = vmatpush3.xpose.msk.msra.mxu1 %vm847_vm2, %v1011_v49  ;;  %1923 = vmatprep.mubr.msk.f32.mxu1 %vm2446_vm0, %v2447_v1 }
 0x403   : > { %1926 = vmatprep.subr.mxu1 %v2447_v1 }
 0x405   : > { %1924 = vmatmul.mubr.msk.f32.vlgmr.msra.gmra.mrb[6].mxu1 %vm847_vm2, %v1009_v50 }
 0x406   : > { %1928 = vmatprep.mubr.msk.f32.mxu1 %vm2446_vm0, %v2447_v1 }
 0x4ce   : > { %v1248_v58 = vpop.f32.mrb[4].mxu0 }
 0x4cf   : > { %v1249_v59 = vadd.f32 %v1248_v58, %v846_v35  ;;  %v1935_v60 = vpop.f32.mrb[5].mxu0 }
 0x4d1   : > { %v1252_v61 = vsel %vm847_vm2, %v1249_v59, -inf }
 0x4d2   : > { %1253 = vmax.xlane.f32.xlu0 %v1252_v61  ;;  %v1413_v62 = vpop.f32.mrb[6].mxu0 }
 0x4d3   : > { %v1945_v63 = vpop.f32.mrb[7].mxu0  ;;  %v1414_v7 = vadd.f32 %v1413_v62, %v846_v35 }
 0x4d4   : > { %v2927_v2 = vpop.f32.mrb[4].mxu1 }
 0x4d5   : > { %v1920_v3 = vpop.f32.mrb[5].mxu1  ;;  %v1417_v9 = vsel %vm847_vm2, %v1414_v7, -inf }
 0x4d8   : > { %v1082_v4 = vpop.f32.mrb[6].mxu1 }
 0x4d9   : > { %v1083_v5 = vadd.f32 %v1082_v4, %v846_v35  ;;  %v1925_v6 = vpop.f32.mrb[7].mxu1 }
 0x4db   : > { %v1086_v8 = vsel %vm847_vm2, %v1083_v5, -inf }
 0x4dc   : > { %1087 = vmax.xlane.f32.xlu1 %v1086_v8 }
 0x4e0   : > { %1418 = vmax.xlane.f32.xlu1 %v1417_v9 }
 0x55f   : > { %v1254_v10 = vpop.xlane.xlu0 %1253 }
 0x560   : > { %v1255_v11 = vsub.f32 %v1249_v59, %v1254_v10 }
 0x562   : > { %v1256_v12 = vmul.f32 1.442695, %v1255_v11 }
 0x564   : > { %2109 = vpow2.f32 %v1256_v12 }
 0x569   : > { %v1088_v13 = vpop.xlane.xlu1 %1087 }
 0x56a   : > { %v1089_v21 = vsub.f32 %v1083_v5, %v1088_v13 }
 0x56c   : > { %v1090_v22 = vmul.f32 1.442695, %v1089_v21 }
 0x56d   : > { %v1419_v14 = vpop.xlane.xlu1 %1418 }
 0x56e   : > { %v2110_v15 = vpop.eup %2109  ;;  %v1420_v16 = vsub.f32 %v1414_v7, %v1419_v14 }
 0x56f   : > { %v1258_v17 = vsel %vm847_vm2, %v2110_v15, 0.0 }
 0x570   : > { %v1421_v18 = vmul.f32 1.442695, %v1420_v16  ;;  %1259 = vadd.xlane.f32.xlu0 %v1258_v17 }
 0x572   : > { %2111 = vpow2.f32 %v1421_v18 }
 0x573   : > { %2113 = vpow2.f32 %v1090_v22 }
 0x57c   : > { %v2112_v19 = vpop.eup %2111 }
 0x57d   : > { %v1423_v20 = vsel %vm847_vm2, %v2112_v19, 0.0  ;;  %v2114_v23 = vpop.eup %2113 }
 0x57e   : > { %1424 = vadd.xlane.f32.xlu1 %v1423_v20  ;;  %v1092_v24 = vsel %vm847_vm2, %v2114_v23, 0.0 }
 0x586   : > { %1098 = vrot.lane.b32.xlu0 %v2903_v47, %s2448_s5  ;;  %s3105_s5 = sld [smem:[#allocation28_spill]] }
 0x58c   : > { %p3108_p8 = scmp.ne.s32.totalorder %s3105_s5, 0 }
 0x58e   : > { %p2353_p5 = pnand %p2352_p6, %p3108_p8 }
 0x58f   : > { %1263 = vrot.lane.b32.xlu1 %v2903_v47, %s2449_s27 }
 0x590   : > { %p2354_p2 = pneg %p2353_p5 }
 0x592   : > { %p2361_p13 = pnand %p2360_p1, %p2354_p2 }
 0x5b3   : > { %1093 = vadd.xlane.f32.xlu1 %v1092_v24 }
 0x5c4   : > { %1428 = vrot.lane.b32.xlu1 %v2903_v47, %s2450_s26 }
 0x5fd   : > { %v1260_v25 = vpop.xlane.xlu0 %1259 }
 0x601   : > { %v1099_v26 = vpop.permute.xlu0 %1098 }
 0x602   : > { %1927 = vmatpush3.msra.mxu1 %v1099_v26 }
 0x603   : > { %1936 = vmatprep.subr.mxu1 %v2447_v1 }
 0x60b   : > { %v1425_v27 = vpop.xlane.xlu1 %1424 }
 0x60f   : > { %v1264_v28 = vpop.permute.xlu1 %1263 }
 0x640   : > { %v1094_v29 = vpop.xlane.xlu1 %1093 }
 0x641   : > { %2115 = vrcp.f32 %v1094_v29 }
 0x642   : > { %2117 = vrcp.f32 %v1260_v25 }
 0x643   : > { %2119 = vrcp.f32 %v1425_v27 }
 0x644   : > { %v1429_v35 = vpop.permute.xlu1 %1428 }
 0x64b   : > { %v2116_v30 = vpop.eup %2115 }
 0x64c   : > { %v1096_v31 = vmul.f32 %v2116_v30, %v2114_v23  ;;  %v2118_v32 = vpop.eup %2117 }
 0x64d   : > { %v1262_v33 = vmul.f32 %v2118_v32, %v2110_v15  ;;  %v2120_v34 = vpop.eup %2119 }
 0x64e   : > { %1929 = vmatmul.mubr.msk.f32.vlgmr.msra.gmra.mrb[8].mxu1 %vm847_vm2, %v1096_v31  ;;  %v1427_v36 = vmul.f32 %v2120_v34, %v2112_v19 }
 0x64f   : > { %1937 = vmatpush3.msra.mxu1 %v1264_v28  ;;  %1938 = vmatprep.mubr.msk.f32.mxu1 %vm2446_vm0, %v2447_v1 }
 0x650   : > { %1946 = vmatprep.subr.mxu1 %v2447_v1 }
 0x652   : > { %1939 = vmatmul.mubr.msk.f32.vlgmr.msra.gmra.mrb[10].mxu1 %vm847_vm2, %v1262_v33 }
 0x653   : > { %1947 = vmatpush3.msra.mxu1 %v1429_v35  ;;  %1948 = vmatprep.mubr.msk.f32.mxu1 %vm2446_vm0, %v2447_v1  ;;  %v1524_v1 = vld [vmem:[%s3104_s16 + $0x18] sm:$0xff] }
 0x654   : > { %v1984_v41 = vpack.c.bf16 %v1524_v1, %v1523_v40 }
 0x656   : > { %1949 = vmatmul.mubr.msk.f32.vlgmr.msra.gmra.mrb[12].mxu1 %vm847_vm2, %v1427_v36  ;;  %1985 = vmatpush3.bf16.msra.mxu0 %v1984_v41 }
 0x721   : > { %v1170_v42 = vpop.f32.mrb[8].mxu1 }
 0x722   : > { %1505 = vrot.lane.b32.xlu0 %v1170_v42, %s2452_s29  ;;  %v1930_v43 = vpop.f32.mrb[9].mxu1 }
 0x725   : > { %v1335_v44 = vpop.f32.mrb[10].mxu1 }
 0x726   : > { %1509 = vrot.lane.b32.xlu1 %v1335_v44, %s2453_s19  ;;  %v1940_v45 = vpop.f32.mrb[11].mxu1 }
 0x729   : > { %v1500_v0 = vpop.f32.mrb[12].mxu1 }
 0x72a   : > { %1513 = vrot.lane.b32.xlu0 %v1500_v0, %s2454_s25  ;;  %v1950_v46 = vpop.f32.mrb[13].mxu1 }
 0x794   : > { %v1506_v47 = vpop.permute.xlu0 %1505 }
 0x795   : > { %v1516_v49 = vsel %vm847_vm2, %v2927_v2, %v1506_v47 }
 0x798   : > { %v1510_v48 = vpop.permute.xlu1 %1509 }
 0x799   : > { %v1518_v50 = vsel %vm1517_vm4, %v1516_v49, %v1510_v48 }
 0x79c   : > { %v1514_v51 = vpop.permute.xlu0 %1513 }
 0x79d   : > { %v1520_v52 = vsel %vm1519_vm5, %v1518_v50, %v1514_v51 }
 0x79e   : > { %1960 = vmatmul.mubr.msk.f32.vlgmr.msra.gmra.mrb[8].mxu0 %vm598_vm1, %v1520_v52 }
 0x871   : > { %v1601_v54 = vpop.f32.mrb[8].mxu0 }
 0x872   : > { %v1602_v55 = vadd.f32 %v1836_v53, %v1601_v54  ;;  %v1961_v56 = vpop.f32.mrb[9].mxu0 }
 0x874   : > { %1605 = vst.msk [vmem:[%s581_s30] sm:$0xff] %vm598_vm1, %v1602_v55 }
 0x875   : > { %2364 = shalt.err (!%p2361_p13)
}
 0x876   : > { %s2365_s14 = scalar_lea.hbm %s2973_s13, 128  ;;  %s2369_s7 = scalar_lea.hbm %s3107_s3, 256 }
 0x877   : > { %p2366_p12 = scmp.ne.s32.totalorder %s2973_s13, %s2365_s14  ;;  %p2370_p9 = scmp.lt.u32.totalorder %s2973_s13, %s3107_s3 }
 0x878   : > { %p2371_p3 = scmp.lt.u32.totalorder %s2369_s7, %s2365_s14  ;;  %p2373_p6 = scmp.lt.u32.totalorder %s2365_s14, %s2973_s13 }
 0x879   : > { %p2367_p0 = pnand %p2366_p12, %p3108_p8 }
 0x87a   : > { %p2372_p11 = por %p2371_p3, %p2370_p9 }
 0x87b   : > { %p2368_p7 = pneg %p2367_p0 }
 0x87c   : > { %p2374_p5 = por %p2373_p6, %p2372_p11 }
 0x87e   : > { %p2375_p2 = pnand %p2374_p5, %p2368_p7 }
 0x880   : > { %2378 = shalt.err (!%p2375_p2)
}
 0x881   : > { %2012 = dma.vmem_to_hbm [thread:$0]  (%p3108_p8), %s2975_s21, 128, %s2973_s13, %s1607_s4  }
 0x882 PF: > { %s3109_s25 = sld [smem:[#allocation23_spill]]  ;;  %s3110_s27 = sld [smem:[#allocation29_spill]] }
 0x883   : > { %s3111_s26 = sld [smem:[#allocation24_spill]] }
 0x888   : > { %s1632_s12 = sand.u32 1, %s3109_s25   ;;  %p3112_p4 = scmp.ne.s32.totalorder %s3110_s27, 0 }
 0x889   : > { %p3113_p10 = scmp.ge.s32.totalorder %s3111_s26, 2  ;;  %s1633_s20 = scalar_lea.sflag [#allocation4], %s1632_s12 }
 0x88b   : > { %p2041_p1 = pnand %p3113_p10, %p3112_p4 }
 0x88d   : > { %2416 = dma.done.wait (!%p2041_p1), %s1633_s20, 128  }
 0x88e   : > { %2418 = vsyncadd (!%p2041_p1), %s1633_s20, 4294967168  ;;  %s3114_s24 = sld [smem:[#allocation26_spill]]  ;;  %s3115_s30 = sld [smem:[#allocation27_spill]] }
 0x88f   : > { %s3116_s21 = smov %s2425_s22  ;;  %s3117_s22 = smov %s2429_s23 }
 0x894   : > { %p31_p13 = scmp.ge.s32.totalorder %s3114_s24, 4   ;;  %s3118_s23 = smov %s3115_s30 }
 0x896   :  { %33 = sbr.rel (!%p31_p13) target bundleno = 19 (0x13), region = 160 }
 0x89d   :  { %1638 = vsyncpa [#allocation3], 1 }
 0x89e   :  { %1640 = vsyncpa [#allocation3 + $0x1], 1 }
 0x89f   :  { %1641 = vsyncpa [#allocation6], 1 }
 0x8a0   :  { %1643 = vsyncpa [#allocation6 + $0x1], 1 }
 0x8a1   :  { %1644 = vsyncpa [#allocation9], 1 }
 0x8a2   :  { %1645 = vsyncpa [#allocation12], 1 }
 0x8a3   :  { %1646 = vsyncpa [#allocation15], 1 }
 0x8a4   :  { %1647 = vsyncpa [#allocation4], 1 }
 0x8a5   :  { %1649 = vsyncpa [#allocation4 + $0x1], 1 }

// kernel: tpu_custom_call.1
= control target key start
LH: loop header
LB: loop body
LE: loop exit
PB: predicated region body
PF: predicated region fallthrough
CT: control target
= control target key end

     0   :  { %s3018_s0 = inlined_call_operand.hbm [shape: f32[16,32], index: 0, kind: input, shape index: {}]   ;;  %s3019_s1 = inlined_call_operand.hbm [shape: f32[16,32], index: 1, kind: input, shape index: {}]   ;;  %s3020_s2 = inlined_call_operand.hbm [shape: f32[16,32], index: 2, kind: input, shape index: {}]   ;;  %s3021_s3 = inlined_call_operand.vmem [shape: s8[2,8,8], index: 3, kind: input, shape index: {}]   ;;  %s3022_s4 = inlined_call_operand.hbm [shape: f32[32,32], index: 4, kind: input, shape index: {}]   ;;  %s3023_s5 = inlined_call_operand.vmem [shape: f32[1,32], index: 5, kind: input, shape index: {}]   ;;  %s3024_s6 = inlined_call_operand.hbm [shape: f32[32,32], index: 6, kind: input, shape index: {}]   ;;  %s3025_s7 = inlined_call_operand.hbm [shape: f32[1,32], index: 7, kind: input, shape index: {}]   ;;  %s3026_s8 = inlined_call_operand.hbm [shape: f32[32,32], index: 8, kind: input, shape index: {}]   ;;  %s3027_s9 = inlined_call_operand.hbm [shape: f32[1,32], index: 9, kind: input, shape index: {}]   ;;  %s3028_s10 = inlined_call_operand.vmem [shape: f32[32,32], index: 10, kind: input, shape index: {}]   ;;  %s3029_s11 = inlined_call_operand.vmem [shape: f32[1,32], index: 11, kind: input, shape index: {}]   ;;  %s3030_s12 = inlined_call_operand.hbm [shape: f32[16,32], index: 12, kind: output, shape index: {}]  }
   0x1   :  { %3059 = sst [smem:[#allocation30_spill]] %s3019_s1 }
   0x2   :  { %3060 = sst [smem:[#allocation31_spill]] %s3021_s3 }
   0x3   :  { %3061 = sst [smem:[#allocation32_spill]] %s3022_s4 }
   0x4   :  { %3062 = sst [smem:[#allocation33_spill]] %s3023_s5 }
   0x5   :  { %3063 = sst [smem:[#allocation34_spill]] %s3025_s7 }
   0x6   :  { %3064 = sst [smem:[#allocation35_spill]] %s3028_s10 }
   0x7   :  { %3065 = sst [smem:[#allocation36_spill]] %s3029_s11 }
   0x8   :  { %3066 = sst [smem:[#allocation37_spill]] %s3030_s12 }
   0x9   :  { %17 = vsyncpa [#allocation3], 0 }
   0xa   :  { %19 = vsyncpa [#allocation3 + $0x1], 0 }
   0xb   :  { %20 = vsyncpa [#allocation6], 0 }
   0xc   :  { %22 = vsyncpa [#allocation6 + $0x1], 0 }
   0xd   :  { %23 = vsyncpa [#allocation9], 0 }
   0xe   :  { %24 = vsyncpa [#allocation12], 0 }
   0xf   :  { %25 = vsyncpa [#allocation15], 0 }
  0x10   :  { %26 = vsyncpa [#allocation4], 0 }
  0x11   :  { %28 = vsyncpa [#allocation4 + $0x1], 0  ;;  %s2521_s21 = smov 0   ;;  %s2523_s22 = smov 0  }
  0x12   :  { %s2525_s23 = smov 0   ;;  %s2527_s24 = smov 0  }
  0x13 LB: > { %3067 = sst [smem:[#allocation23_spill]] %s2421_s21  ;;  %s2435_s25 = smov [#allocation8]   ;;  %s2433_s24 = sphi %s2527_s24, %s3114_s24   ;;  %s2429_s23 = sphi %s2525_s23, %s3118_s23   ;;  %s2425_s22 = sphi %s2523_s22, %s3117_s22   ;;  %s2421_s21 = sphi %s2521_s21, %s3116_s21  }
  0x14   : > { %3068 = sst [smem:[#allocation24_spill]] %s2433_s24  ;;  %s349_s26 = sshll.u32 %s2435_s25, 4  ;;  %s2547_s26 = int_to_ptr.vmem [resolvable:$true] %s349_s26 }
  0x15   : > { %s2542_s27 = sadd.s32 4294967295, %s2433_s24   ;;  %p1794_p0 = scmp.ge.s32.totalorder %s2433_s24, 1 }
  0x16   : > { %3069 = sst [smem:[#allocation25_spill]] %s2542_s27  ;;  %p3044_p1 = scmp.eq.s32.totalorder %s2542_s27, 0 }
  0x17   : > { %p337_p2 = scmp.lt.s32.totalorder %s2433_s24, 3  ;;  %s2436_s29 = smov [#allocation11]  }
  0x18   : > { %s379_s30 = sshll.u32 %s2436_s29, 4  ;;  %s3072_s4 = sld [smem:[#allocation32_spill]]  ;;  %s2562_s30 = int_to_ptr.vmem [resolvable:$true] %s379_s30 }
  0x19   : > { %p2549_p3 = pnand %p1794_p0, %p337_p2 }
  0x1b   : > { %s3070_s28 = scalar_select %p2549_p3, 1, 0 }
  0x1c   : > { %p2014_p5 = pneg %p2549_p3 }
  0x1e   : > { %p2558_p6 = pnand %p2014_p5, %p3044_p1  ;;  %s2121_s16 = scalar_lea.hbm %s3072_s4, 512 }
  0x1f   : > { %p2122_p7 = scmp.ne.s32.totalorder %s3072_s4, %s2121_s16  ;;  %p2128_p11 = scmp.lt.u32.totalorder %s2121_s16, %s3072_s4 }
  0x20   : > { %s3071_s13 = scalar_select %p2558_p6, 1, 0 }
  0x21   : > { %p2572_p8 = pneg %p2558_p6 }
  0x23   : > { %s3073_s19 = scalar_select %p2572_p8, 1, 0 }
  0x24   : > { %p2124_p9 = pnand %p2572_p8, %p2122_p7 }
  0x26   : > { %p2125_p10 = pneg %p2124_p9 }
  0x28   : > { %p2130_p12 = pnand %p2128_p11, %p2125_p10 }
  0x2a   : > { %2133 = shalt.err (!%p2130_p12)
}
  0x2b   : > { %s2134_s29 = scalar_lea.vmem %s2547_s26, 512  ;;  %p2142_p5 = scmp.lt.s32.totalorder %s2547_s26, %s2547_s26 }
  0x2c   : > { %p2135_p13 = scmp.ne.s32.totalorder %s2547_s26, %s2134_s29  ;;  %p2143_p4 = scmp.lt.s32.totalorder %s2134_s29, %s2134_s29 }
  0x2e   : > { %p2137_p0 = pnand %p2135_p13, %p2572_p8  ;;  %p2144_p7 = por %p2143_p4, %p2142_p5 }
  0x30   : > { %p2138_p2 = pneg %p2137_p0 }
  0x32   : > { %p2145_p9 = pnand %p2144_p7, %p2138_p2 }
  0x34   : > { %2148 = shalt.err (!%p2145_p9)
}
  0x35   : > { %s3034_s14 = smov 128   ;;  %s3036_s15 = smov 8  }
  0x36   : > { %2017 = dma.hbm_to_vmem [thread:$0]  (!%p2558_p6), %s3072_s4, 512, %s2547_s26, [#allocation9], %s3034_s14, %s3034_s14, %s3036_s15  }
  0x37   : > { %s3074_s7 = sld [smem:[#allocation34_spill]] }
  0x3d   : > { %s2149_s25 = scalar_lea.hbm %s3074_s7, 16 }
  0x3e   : > { %p2150_p4 = scmp.ne.s32.totalorder %s3074_s7, %s2149_s25  ;;  %p2156_p12 = scmp.lt.u32.totalorder %s2149_s25, %s3074_s7 }
  0x40   : > { %p2152_p10 = pnand %p2150_p4, %p2572_p8 }
  0x42   : > { %p2153_p11 = pneg %p2152_p10 }
  0x44   : > { %p2158_p13 = pnand %p2156_p12, %p2153_p11 }
  0x46   : > { %2161 = shalt.err (!%p2158_p13)
}
  0x47   : > { %s2162_s26 = scalar_lea.vmem %s2562_s30, 16  ;;  %s2169_s12 = scalar_lea.vmem %s2562_s30, 32 }
  0x48   : > { %p2163_p0 = scmp.ne.s32.totalorder %s2562_s30, %s2162_s26  ;;  %p2170_p7 = scmp.lt.s32.totalorder %s2562_s30, %s2562_s30 }
  0x49   : > { %p2171_p9 = scmp.lt.s32.totalorder %s2169_s12, %s2162_s26 }
  0x4a   : > { %p2165_p2 = pnand %p2163_p0, %p2572_p8 }
  0x4b   : > { %p2172_p4 = por %p2171_p9, %p2170_p7 }
  0x4c   : > { %p2166_p5 = pneg %p2165_p2 }
  0x4e   : > { %p2173_p10 = pnand %p2172_p4, %p2166_p5 }
  0x50   : > { %2176 = shalt.err (!%p2173_p10)
}
  0x51   : > { %2023 = dma.hbm_to_vmem [thread:$0]  (!%p2558_p6), %s3074_s7, 16, %s2562_s30, [#allocation12]  }
  0x52   : > { %s1793_s16 = sadd.s32 4294967294, %s2433_s24   ;;  %s2622_s17 = sadd.s32 1, %s2433_s24  }
  0x53   : > { %3075 = sst [smem:[#allocation26_spill]] %s2622_s17  ;;  %s38_s18 = ssub.s32 %s2433_s24, %s2622_s17 }
  0x54   : > { %s41_s20 = sadd.s32 1, %s2429_s23  ;;  %p39_p11 = scmp.eq.s32.totalorder %s38_s18, 0 }
  0x55   : > { %p48_p12 = scmp.ne.s32.totalorder %s2429_s23, %s2425_s22  ;;  %p49_p13 = scmp.eq.s32.totalorder %s2433_s24, 0 }
  0x56   : > { %p54_p0 = scmp.ne.s32.totalorder %s2425_s22, %s2421_s21  ;;  %p324_p7 = scmp.eq.s32.totalorder %s2542_s27, 1 }
  0x57   : > { %s2633_s25 = scalar_select %p39_p11, %s2429_s23, %s41_s20  }
  0x58   : > { %p50_p2 = por %p49_p13, %p48_p12  ;;  %p2637_p5 = por %p3044_p1, %p54_p0 }
  0x59   : > { %3076 = sst [smem:[#allocation27_spill]] %s2633_s25  ;;  %p330_p9 = scmp.eq.s32.totalorder %s1793_s16, 1 }
  0x5a   : > { %s3077_s29 = scalar_select %p2637_p5, 1, 0 }
  0x5b   : > { %p2049_p4 = scmp.lt.s32.totalorder %s2433_s24, 2  ;;  %s3038_s30 = sand.u32 1, %s2429_s23  }
  0x5c   : > { %p2644_p10 = por %p324_p7, %p48_p12  ;;  %p2648_p3 = por %p330_p9, %p54_p0 }
  0x5d   : > { %s2654_s10 = sshll.u32 %s3038_s30, 3  ;;  %s2657_s11 = sshll.u32 %s2433_s24, 7 }
  0x5e   : > { %s3078_s26 = scalar_select %p2644_p10, 1, 0 }
  0x5f   : > { %s3080_s12 = scalar_select %p2648_p3, 1, 0 }
  0x60   : > { %3079 = sst [smem:[#allocation28_spill]] %s3078_s26  ;;  %p2659_p11 = pnand %p2049_p4, %p50_p2 }
  0x61   : > { %3081 = sst [smem:[#allocation29_spill]] %s3080_s12  ;;  %s438_s16 = sand.u32 1, %s2433_s24  }
  0x62   : > { %s3082_s18 = scalar_select %p2659_p11, 1, 0 }
  0x63   : > { %s3083_s1 = sld [smem:[#allocation30_spill]]  ;;  %s442_s30 = scalar_lea.vmem [#allocation5], %s2654_s10 }
  0x64   : > { %s449_s4 = sshll.u32 %s442_s30, 4  ;;  %s2439_s7 = smov [#allocation10]   ;;  %s2671_s4 = int_to_ptr.vmem [resolvable:$true] %s449_s4 }
  0x65   : > { %s2673_s25 = sshll.u32 %s2439_s7, 4  ;;  %s2675_s17 = scalar_lea.sflag [#allocation6], %s438_s16  ;;  %s366_s25 = int_to_ptr.vmem [resolvable:$true] %s2673_s25 }
  0x66   : > { %p2681_p13 = pneg %p2659_p11 }
  0x68   : > { %s3084_s14 = scalar_select %p2681_p13, 1, 0 }
  0x69   : > { %s2668_s15 = scalar_lea.hbm %s3083_s1, %s2657_s11  ;;  %s2182_s24 = scalar_lea.hbm %s3083_s1, 256 }
  0x6a   : > { %s2177_s12 = scalar_lea.hbm %s2668_s15, 128  ;;  %p2183_p7 = scmp.lt.u32.totalorder %s2668_s15, %s3083_s1 }
  0x6b   : > { %p2178_p12 = scmp.ne.s32.totalorder %s2668_s15, %s2177_s12  ;;  %p2184_p9 = scmp.lt.u32.totalorder %s2182_s24, %s2177_s12 }
  0x6c   : > { %p2186_p1 = scmp.lt.u32.totalorder %s2177_s12, %s2668_s15 }
  0x6d   : > { %p2180_p0 = pnand %p2681_p13, %p2178_p12  ;;  %p2185_p4 = por %p2184_p9, %p2183_p7 }
  0x6f   : > { %p2181_p2 = pneg %p2180_p0  ;;  %p2187_p3 = por %p2186_p1, %p2185_p4 }
  0x71   : > { %p2188_p10 = pnand %p2187_p3, %p2181_p2 }
  0x73   : > { %2191 = shalt.err (!%p2188_p10)
}
  0x74   : > { %s2192_s16 = scalar_lea.vmem %s2671_s4, 128  ;;  %s2440_s20 = smov [#allocation5]  }
  0x75   : > { %p2193_p12 = scmp.ne.s32.totalorder %s2671_s4, %s2192_s16  ;;  %s2197_s30 = sshll.u32 %s2440_s20, 4  ;;  %s2198_s30 = int_to_ptr.vmem [resolvable:$false] %s2197_s30 }
  0x76   : > { %s2199_s21 = scalar_lea.vmem %s2198_s30, 256  ;;  %p2200_p6 = scmp.lt.s32.totalorder %s2671_s4, %s2198_s30 }
  0x77   : > { %p2195_p0 = pnand %p2193_p12, %p2681_p13  ;;  %p2201_p8 = scmp.lt.s32.totalorder %s2199_s21, %s2192_s16 }
  0x79   : > { %p2196_p5 = pneg %p2195_p0  ;;  %p2202_p7 = por %p2201_p8, %p2200_p6 }
  0x7b   : > { %p2203_p9 = pnand %p2202_p7, %p2196_p5 }
  0x7d   : > { %2206 = shalt.err (!%p2203_p9)
}
  0x7e   : > { %2036 = dma.hbm_to_vmem [thread:$0]  (!%p2659_p11), %s2668_s15, 128, %s2671_s4, %s2675_s17  }
  0x7f   : > { %s2207_s7 = scalar_lea.hbm %s3024_s6, 512  ;;  %p3085_p3 = scmp.ne.s32.totalorder %s3073_s19, 0 }
  0x80   : > { %p2208_p1 = scmp.ne.s32.totalorder %s3024_s6, %s2207_s7  ;;  %p2214_p5 = scmp.lt.u32.totalorder %s2207_s7, %s3024_s6 }
  0x82   : > { %p2210_p6 = pnand %p2208_p1, %p3085_p3 }
  0x84   : > { %p2211_p8 = pneg %p2210_p6 }
  0x86   : > { %p2216_p10 = pnand %p2214_p5, %p2211_p8 }
  0x88   : > { %2219 = shalt.err (!%p2216_p10)
}
  0x89   : > { %s2220_s21 = scalar_lea.vmem %s366_s25, 512  ;;  %p2228_p0 = scmp.lt.s32.totalorder %s366_s25, %s366_s25 }
  0x8a   : > { %p2221_p2 = scmp.ne.s32.totalorder %s366_s25, %s2220_s21  ;;  %p2229_p7 = scmp.lt.s32.totalorder %s2220_s21, %s2220_s21 }
  0x8c   : > { %p2223_p4 = pnand %p2221_p2, %p3085_p3  ;;  %p2230_p9 = por %p2229_p7, %p2228_p0 }
  0x8e   : > { %p2224_p12 = pneg %p2223_p4 }
  0x90   : > { %p2231_p11 = pnand %p2230_p9, %p2224_p12 }
  0x92   : > { %2234 = shalt.err (!%p2231_p11)
}
  0x93   : > { %p3086_p1 = scmp.ne.s32.totalorder %s3071_s13, 0  ;;  %s3087_s1 = smov 8  }
  0x94   : > { %s3088_s4 = smov 128   ;;  %s2441_s12 = smov [#allocation13]  }
  0x95   : > { %2020 = dma.hbm_to_vmem [thread:$0]  (!%p3086_p1), %s3024_s6, 512, %s366_s25, [#allocation9], %s3088_s4, %s3088_s4, %s3087_s1  }
  0x96   : > { %s389_s7 = sshll.u32 %s2441_s12, 4  ;;  %s2442_s20 = smov [#allocation14]   ;;  %s390_s7 = int_to_ptr.vmem [resolvable:$true] %s389_s7 }
  0x97   : > { %s403_s16 = sshll.u32 %s2442_s20, 4  ;;  %s2235_s26 = scalar_lea.hbm %s3026_s8, 512  ;;  %s404_s16 = int_to_ptr.vmem [resolvable:$true] %s403_s16 }
  0x98   : > { %p2236_p11 = scmp.ne.s32.totalorder %s3026_s8, %s2235_s26  ;;  %p2242_p5 = scmp.lt.u32.totalorder %s2235_s26, %s3026_s8 }
  0x9a   : > { %p2238_p6 = pnand %p2236_p11, %p3085_p3 }
  0x9c   : > { %p2239_p8 = pneg %p2238_p6 }
  0x9e   : > { %p2244_p10 = pnand %p2242_p5, %p2239_p8 }
  0xa0   : > { %2247 = shalt.err (!%p2244_p10)
}
  0xa1   : > { %s2248_s25 = scalar_lea.vmem %s390_s7, 512  ;;  %p2256_p0 = scmp.lt.s32.totalorder %s390_s7, %s390_s7 }
  0xa2   : > { %p2249_p2 = scmp.ne.s32.totalorder %s390_s7, %s2248_s25  ;;  %p2257_p7 = scmp.lt.s32.totalorder %s2248_s25, %s2248_s25 }
  0xa4   : > { %p2251_p4 = pnand %p2249_p2, %p3085_p3  ;;  %p2258_p9 = por %p2257_p7, %p2256_p0 }
  0xa6   : > { %p2252_p12 = pneg %p2251_p4 }
  0xa8   : > { %p2259_p13 = pnand %p2258_p9, %p2252_p12 }
  0xaa   : > { %2262 = shalt.err (!%p2259_p13)
}
  0xab   : > { %2026 = dma.hbm_to_vmem [thread:$0]  (!%p3086_p1), %s3026_s8, 512, %s390_s7, [#allocation12], %s3088_s4, %s3088_s4, %s3087_s1  }
  0xac   : > { %s2263_s24 = scalar_lea.hbm %s3027_s9, 16 }
  0xad   : > { %p2264_p11 = scmp.ne.s32.totalorder %s3027_s9, %s2263_s24  ;;  %p2270_p8 = scmp.lt.u32.totalorder %s2263_s24, %s3027_s9 }
  0xaf   : > { %p2266_p13 = pnand %p2264_p11, %p3085_p3 }
  0xb1   : > { %p2267_p6 = pneg %p2266_p13 }
  0xb3   : > { %p2272_p5 = pnand %p2270_p8, %p2267_p6 }
  0xb5   : > { %2275 = shalt.err (!%p2272_p5)
}
  0xb6   : > { %s2276_s15 = scalar_lea.vmem %s404_s16, 16  ;;  %s2283_s1 = scalar_lea.vmem %s404_s16, 32 }
  0xb7   : > { %p2277_p10 = scmp.ne.s32.totalorder %s404_s16, %s2276_s15  ;;  %p2284_p12 = scmp.lt.s32.totalorder %s404_s16, %s404_s16 }
  0xb8   : > { %p2285_p0 = scmp.lt.s32.totalorder %s2283_s1, %s2276_s15 }
  0xb9   : > { %p2279_p2 = pnand %p2277_p10, %p3085_p3 }
  0xba   : > { %p2286_p7 = por %p2285_p0, %p2284_p12 }
  0xbb   : > { %p2280_p4 = pneg %p2279_p2 }
  0xbd   : > { %p2287_p9 = pnand %p2286_p7, %p2280_p4 }
  0xbf   : > { %2290 = shalt.err (!%p2287_p9)
}
  0xc0   : > { %2029 = dma.hbm_to_vmem [thread:$0]  (!%p3086_p1), %s3027_s9, 16, %s404_s16, [#allocation15]  }
  0xc1   : > { %s2770_s3 = scalar_lea.hbm %s3018_s0, %s2657_s11  ;;  %s424_s5 = scalar_lea.vmem [#allocation2], %s2654_s10 }
  0xc2   : > { %s431_s13 = sshll.u32 %s424_s5, 4  ;;  %s2779_s24 = scalar_lea.hbm %s3020_s2, %s2657_s11  ;;  %s2773_s13 = int_to_ptr.vmem [resolvable:$true] %s431_s13 }
  0xc3   : > { %s3089_s12 = sand.u32 1, %s2429_s23   ;;  %s2291_s20 = scalar_lea.hbm %s2770_s3, 128 }
  0xc4   : > { %s421_s16 = scalar_lea.sflag [#allocation3], %s3089_s12  ;;  %p2292_p3 = scmp.ne.s32.totalorder %s2770_s3, %s2291_s20 }
  0xc5   : > { %p3090_p1 = scmp.ne.s32.totalorder %s3084_s14, 0  ;;  %s2296_s15 = scalar_lea.hbm %s3018_s0, 256 }
  0xc6   : > { %p2297_p6 = scmp.lt.u32.totalorder %s2770_s3, %s3018_s0  ;;  %p2298_p8 = scmp.lt.u32.totalorder %s2296_s15, %s2291_s20 }
  0xc7   : > { %p2294_p11 = pnand %p2292_p3, %p3090_p1  ;;  %p2300_p10 = scmp.lt.u32.totalorder %s2291_s20, %s2770_s3 }
  0xc8   : > { %p2299_p5 = por %p2298_p8, %p2297_p6 }
  0xc9   : > { %p2295_p13 = pneg %p2294_p11 }
  0xca   : > { %p2301_p2 = por %p2300_p10, %p2299_p5 }
  0xcc   : > { %p2302_p4 = pnand %p2301_p2, %p2295_p13 }
  0xce   : > { %2305 = shalt.err (!%p2302_p4)
}
  0xcf   : > { %s2306_s11 = scalar_lea.vmem %s2773_s13, 128  ;;  %s2443_s7 = smov [#allocation2]  }
  0xd0   : > { %p2307_p12 = scmp.ne.s32.totalorder %s2773_s13, %s2306_s11  ;;  %s2311_s19 = sshll.u32 %s2443_s7, 4  ;;  %s2312_s19 = int_to_ptr.vmem [resolvable:$false] %s2311_s19 }
  0xd1   : > { %s2313_s25 = scalar_lea.vmem %s2312_s19, 256  ;;  %p2314_p9 = scmp.lt.s32.totalorder %s2773_s13, %s2312_s19 }
  0xd2   : > { %p2309_p0 = pnand %p2307_p12, %p3090_p1  ;;  %p2315_p3 = scmp.lt.s32.totalorder %s2313_s25, %s2306_s11 }
  0xd4   : > { %p2310_p7 = pneg %p2309_p0  ;;  %p2316_p11 = por %p2315_p3, %p2314_p9 }
  0xd6   : > { %p2317_p6 = pnand %p2316_p11, %p2310_p7 }
  0xd8   : > { %2320 = shalt.err (!%p2317_p6)
}
  0xd9   : > { %p3091_p13 = scmp.ne.s32.totalorder %s3082_s18, 0  ;;  %s460_s5 = scalar_lea.vmem [#allocation7], %s2654_s10 }
  0xda   : > { %s467_s27 = sshll.u32 %s460_s5, 4  ;;  %s2321_s26 = scalar_lea.hbm %s2779_s24, 128  ;;  %s468_s27 = int_to_ptr.vmem [resolvable:$true] %s467_s27 }
  0xdb   : > { %2033 = dma.hbm_to_vmem [thread:$0]  (!%p3091_p13), %s2770_s3, 128, %s2773_s13, %s421_s16  }
  0xdc   : > { %p2322_p8 = scmp.ne.s32.totalorder %s2779_s24, %s2321_s26  ;;  %s2326_s30 = scalar_lea.hbm %s3020_s2, 256 }
  0xdd   : > { %p2327_p2 = scmp.lt.u32.totalorder %s2779_s24, %s3020_s2  ;;  %p2328_p4 = scmp.lt.u32.totalorder %s2326_s30, %s2321_s26 }
  0xde   : > { %p2324_p5 = pnand %p2322_p8, %p3090_p1  ;;  %p2330_p0 = scmp.lt.u32.totalorder %s2321_s26, %s2779_s24 }
  0xdf   : > { %p2329_p12 = por %p2328_p4, %p2327_p2 }
  0xe0   : > { %p2325_p10 = pneg %p2324_p5 }
  0xe1   : > { %p2331_p7 = por %p2330_p0, %p2329_p12 }
  0xe3   : > { %p2332_p9 = pnand %p2331_p7, %p2325_p10 }
  0xe5   : > { %2335 = shalt.err (!%p2332_p9)
}
  0xe6   : > { %s2336_s10 = scalar_lea.vmem %s468_s27, 128  ;;  %s2444_s3 = smov [#allocation7]  }
  0xe7   : > { %p2337_p3 = scmp.ne.s32.totalorder %s468_s27, %s2336_s10  ;;  %s2341_s13 = sshll.u32 %s2444_s3, 4  ;;  %s2342_s13 = int_to_ptr.vmem [resolvable:$false] %s2341_s13 }
  0xe8   : > { %s2343_s16 = scalar_lea.vmem %s2342_s13, 256  ;;  %p2344_p8 = scmp.lt.s32.totalorder %s468_s27, %s2342_s13 }
  0xe9   : > { %p2339_p11 = pnand %p2337_p3, %p3090_p1  ;;  %p2345_p5 = scmp.lt.s32.totalorder %s2343_s16, %s2336_s10 }
  0xeb   : > { %p2340_p6 = pneg %p2339_p11  ;;  %p2346_p13 = por %p2345_p5, %p2344_p8 }
  0xed   : > { %p2347_p2 = pnand %p2346_p13, %p2340_p6 }
  0xef   : > { %2350 = shalt.err (!%p2347_p2)
}
  0xf0   : > { %p3092_p4 = scmp.ne.s32.totalorder %s3082_s18, 0  ;;  %p3093_p10 = scmp.ne.s32.totalorder %s3070_s28, 0 }
  0xf1   : > { %s2826_s14 = sand.u32 (!%p3093_p10), 1, %s2425_s22   ;;  %p3094_p1 = scmp.ne.s32.totalorder (!%p3093_p10), %s3077_s29, 0 }
  0xf2   : > { %2039 = dma.hbm_to_vmem [thread:$0]  (!%p3092_p4), %s2779_s24, 128, %s468_s27, %s2675_s17  }
  0xf3   : > { %483 = sbr.rel (%p3093_p10) target bundleno = 2178 (0x882), region = 68  ;;  %s2829_s1 = sshll.u32 (!%p3093_p10), %s2826_s14, 3 }
  0xf4   : > { %s486_s4 = scalar_lea.sflag (!%p3093_p10), [#allocation3], %s2826_s14  ;;  %s489_s11 = scalar_lea.vmem (!%p3093_p10), [#allocation2], %s2829_s1 }
  0xfa   : > { %2396 = dma.done.wait (%p3094_p1), %s486_s4, 128  }
  0xfb   : > { %2398 = vsyncadd (%p3094_p1), %s486_s4, 4294967168  ;;  %s3095_s17 = sld [smem:[#allocation25_spill]]  ;;  %s498_s24 = scalar_lea.vmem [#allocation5], %s2829_s1 }
 0x101   : > { %s494_s28 = sand.u32 1, %s3095_s17  }
 0x102   : > { %s495_s18 = scalar_lea.sflag [#allocation6], %s494_s28 }
 0x103   : > { %2400 = dma.done.wait (%p3094_p1), %s495_s18, 256  }
 0x104   : > { %2402 = vsyncadd (%p3094_p1), %s495_s18, 4294967040  ;;  %s507_s7 = scalar_lea.vmem [#allocation7], %s2829_s1  ;;  %p3096_p13 = scmp.eq.s32.totalorder %s3095_s17, 0 }
 0x106   : > { %2404 = dma.done.wait (%p3096_p13), [#allocation9], 1024   ;;  %p3097_p12 = pmov %p3096_p13 }
 0x108   : > { %2406 = vsyncadd (%p3097_p12), [#allocation9], 4294966272  ;;  %p3098_p0 = pmov %p3097_p12 }
 0x10a   : > { %2408 = dma.done.wait (%p3098_p0), [#allocation12], 528   ;;  %p3099_p7 = pmov %p3098_p0 }
 0x10b   : > { %p3100_p9 = pmov %p3098_p0 }
 0x10c   : > { %2410 = vsyncadd (%p3099_p7), [#allocation12], 4294966768 }
 0x10d   : > { %2412 = dma.done.wait (%p3100_p9), [#allocation15], 16   ;;  %p3101_p3 = pmov %p3098_p0 }
 0x10e   : > { %v2445_v0 = vmov 0.0|0.0   ;;  %vm2446_vm0 = vmmov 0   ;;  %v2447_v1 = vmov 0.0   ;;  %v674_v2 = vld [vmem:[#allocation10] sm:$0xff]  ;;  %v675_v3 = vld [vmem:[#allocation10 + $0x8] sm:$0xff]  ;;  %v676_v7 = vld [vmem:[#allocation10 + $0x10] sm:$0xff] }
 0x10f   : > { %2414 = vsyncadd (%p3101_p3), [#allocation15], 4294967280  ;;  %1968 = vmatprep.subr.bf16.mxu1 %v2445_v0  ;;  %1962 = vmatprep.subr.bf16.mxu0 %v2445_v0  ;;  %v587_v4 = vld [vmem:[#allocation8] sm:$0xff]  ;;  %v1969_v5 = vpack.c.bf16 %v675_v3, %v674_v2  ;;  %v588_v6 = vld [vmem:[#allocation8 + $0x8] sm:$0xff]  ;;  %vm598_vm1 = vcmask 261120   ;;  %s3102_s25 = sld [smem:[#allocation33_spill]] }
 0x110   : > { %1897 = vmatprep.mubr.msk.f32.mxu1 %vm2446_vm0, %v2447_v1  ;;  %1886 = vmatprep.mubr.msk.f32.mxu0 %vm2446_vm0, %v2447_v1  ;;  %v677_v8 = vld [vmem:[#allocation10 + $0x18] sm:$0xff]  ;;  %v1963_v9 = vpack.c.bf16 %v588_v6, %v587_v4  ;;  %v589_v10 = vld [vmem:[#allocation8 + $0x10] sm:$0xff]  ;;  %v673_v14 = vld [vmem:[%s498_s24] sm:$0xff]  ;;  %vm847_vm2 = vcmask 64512   ;;  %s2448_s5 = smov 120   ;;  %s2449_s27 = smov 112  }
 0x111   : > { %v590_v11 = vld [vmem:[#allocation8 + $0x18] sm:$0xff]  ;;  %1970 = vmatpush3.bf16.msra.mxu1 %v1969_v5  ;;  %v1972_v12 = vpack.c.bf16 %v677_v8, %v676_v7  ;;  %v1820_v16 = vld [vmem:[#allocation11] ss:$0 sm:$0xff]  ;;  %s2450_s26 = smov 104   ;;  %v759_v25 = vld [vmem:[#allocation13] sm:$0xff]  ;;  %p582_p11 = scmp.lt.s32.totalorder %s3095_s17, 1 }
 0x112   : > { %1964 = vmatpush3.bf16.msra.mxu0 %v1963_v9  ;;  %1971 = vmatprep.subr.bf16.mxu1 %v2445_v0  ;;  %v1966_v13 = vpack.c.bf16 %v590_v11, %v589_v10  ;;  %v586_v15 = vld [vmem:[%s489_s11] sm:$0xff]  ;;  %s3103_s15 = sld [smem:[#allocation31_spill]]  ;;  %v2451_v34 = vmov -1e+09   ;;  %v1822_v45 = vld [vmem:[#allocation14] ss:$0 sm:$0xff] }
 0x113   : > { %1965 = vmatprep.subr.bf16.mxu0 %v2445_v0  ;;  %v760_v26 = vld [vmem:[#allocation13 + $0x8] sm:$0xff]  ;;  %v761_v27 = vld [vmem:[#allocation13 + $0x10] sm:$0xff]  ;;  %v762_v29 = vld [vmem:[#allocation13 + $0x18] sm:$0xff]  ;;  %s583_s12 = scalar_select %p582_p11, %s3095_s17, 1  ;;  %vm1517_vm4 = vcmask 130048   ;;  %vm1519_vm5 = vcmask 195584  }
 0x114   : > { %v1975_v28 = vpack.c.bf16 %v760_v26, %v759_v25  ;;  %v1978_v30 = vpack.c.bf16 %v762_v29, %v761_v27  ;;  %v758_v31 = vld [vmem:[%s507_s7] sm:$0xff]  ;;  %s3104_s16 = sld [smem:[#allocation35_spill]]  ;;  %s2452_s29 = smov 8  }
 0x115   : > { %1973 = vmatpush3.bf16.msra.mxu1 %v1972_v12  ;;  %v1818_v17 = vld [vmem:[%s3102_s25] ss:$0 sm:$0xff]  ;;  %s1817_s20 = sshll.u32 %s583_s12, 1  ;;  %s2453_s19 = smov 16  }
 0x116   : > { %1967 = vmatpush3.bf16.msra.mxu0 %v1966_v13  ;;  %1911 = vmatprep.subr.mxu1 %v2447_v1  ;;  %s2454_s25 = smov 24   ;;  %s3106_s12 = sld [smem:[#allocation36_spill]] }
 0x117   : > { %1974 = vmatprep.subr.bf16.mxu0 %v2445_v0  ;;  %s581_s30 = scalar_lea.vmem [#allocation16], %s2829_s1  ;;  %s3107_s3 = sld [smem:[#allocation37_spill]] }
 0x118   : > { %1898 = vmatmul.mubr.msk.f32.vlgmr.msra.gmra.mrb[0].mxu1 %vm598_vm1, %v673_v14  ;;  %s585_s10 = scalar_lea.vmem %s3103_s15, %s1817_s20  ;;  %s1839_s20 = sshll.u32 %s3095_s17, 7 }
 0x119   : > { %1887 = vmatmul.mubr.msk.f32.vlgmr.msra.gmra.mrb[0].mxu0 %vm598_vm1, %v586_v15  ;;  %1913 = vmatprep.mubr.msk.f32.mxu1 %vm2446_vm0, %v2447_v1  ;;  %v843_v32 = vld [vmem:[%s585_s10] sm:$0x3]  ;;  %s1620_s21 = sshll.u32 %s581_s30, 4  ;;  %s1607_s4 = scalar_lea.sflag [#allocation4], %s2826_s14  ;;  %s2975_s21 = int_to_ptr.vmem [resolvable:$true] %s1620_s21 }
 0x11a   : > { %1908 = vmatprep.mubr.msk.f32.mxu0 %vm2446_vm0, %v2447_v1  ;;  %1976 = vmatpush3.bf16.msra.mxu0 %v1975_v28  ;;  %v844_v33 = vunpack.c.0.s8 %v843_v32  ;;  %s2351_s11 = scalar_lea.vmem %s2975_s21, 128  ;;  %s2455_s1 = smov [#allocation16]  }
 0x11b   : > { %1977 = vmatprep.subr.bf16.mxu0 %v2445_v0  ;;  %p2352_p6 = scmp.ne.s32.totalorder %s2975_s21, %s2351_s11  ;;  %s2355_s17 = sshll.u32 %s2455_s1, 4  ;;  %s2356_s17 = int_to_ptr.vmem [resolvable:$false] %s2355_s17 }
 0x11c   : > { %vm845_vm3 = vcmp.ne.s32.totalorder %v844_v33, 0  ;;  %s2357_s28 = scalar_lea.vmem %s2356_s17, 256  ;;  %p2358_p4 = scmp.lt.s32.totalorder %s2975_s21, %s2356_s17 }
 0x11d   : > { %v846_v35 = vsel %vm845_vm3, 0.0, %v2451_v34  ;;  %s2973_s13 = scalar_lea.hbm %s3107_s3, %s1839_s20  ;;  %p2359_p10 = scmp.lt.s32.totalorder %s2357_s28, %s2351_s11 }
 0x11e   : > { %1979 = vmatpush3.bf16.msra.mxu0 %v1978_v30 }
 0x11f   : > { %1931 = vmatprep.subr.mxu0 %v2447_v1  ;;  %p2360_p1 = por %p2359_p10, %p2358_p4 }
 0x121   : > { %1909 = vmatmul.mubr.msk.f32.vlgmr.msra.gmra.mrb[2].mxu0 %vm598_vm1, %v758_v31 }
 0x122   : > { %1933 = vmatprep.mubr.msk.f32.mxu0 %vm2446_vm0, %v2447_v1 }
 0x1eb   : > { %v754_v18 = vpop.f32.mrb[0].mxu1 }
 0x1ec   : > { %v755_v19 = vadd.f32 %v1820_v16, %v754_v18  ;;  %v668_v20 = vpop.f32.mrb[0].mxu0  ;;  %v1899_v21 = vpop.f32.mrb[1].mxu1 }
 0x1ed   : > { %v669_v22 = vadd.f32 %v1818_v17, %v668_v20  ;;  %v1888_v23 = vpop.f32.mrb[1].mxu0 }
 0x1ee   : > { %1010 = vrot.lane.b32.xlu1 %v755_v19, %s2448_s5  ;;  %1912 = vmatpush3.xpose.msk.msra.mxu1 %vm847_vm2, %v755_v19 }
 0x1ef   : > { %v672_v24 = vmul.f32 0.35355338, %v669_v22  ;;  %1916 = vmatprep.subr.mxu1 %v2447_v1 }
 0x1f1   : > { %1914 = vmatmul.mubr.msk.f32.vlgmr.msra.gmra.mrb[2].mxu1 %vm847_vm2, %v672_v24 }
 0x1f2   : > { %1008 = vrot.lane.b32.xlu1 %v672_v24, %s2448_s5  ;;  %1918 = vmatprep.mubr.msk.f32.mxu1 %vm2446_vm0, %v2447_v1 }
 0x1f4   : > { %v839_v46 = vpop.f32.mrb[2].mxu0 }
 0x1f5   : > { %v2903_v47 = vadd.f32 %v1822_v45, %v839_v46  ;;  %v1910_v48 = vpop.f32.mrb[3].mxu0 }
 0x1f6   : > { %1174 = vrot.lane.b32.xlu1 %v672_v24, %s2449_s27 }
 0x1f7   : > { %1917 = vmatpush3.msra.mxu1 %v2903_v47 }
 0x1f8   : > { %1921 = vmatprep.subr.mxu1 %v2447_v1 }
 0x1fa   : > { %1341 = vrot.lane.b32.xlu1 %v755_v19, %s2450_s26 }
 0x1fe   : > { %1339 = vrot.lane.b32.xlu1 %v672_v24, %s2450_s26 }
 0x260   : > { %v1011_v49 = vpop.permute.xlu1 %1010 }
 0x264   : > { %v1009_v50 = vpop.permute.xlu1 %1008 }
 0x268   : > { %v1175_v51 = vpop.permute.xlu1 %1174 }
 0x26c   : > { %v1342_v54 = vpop.permute.xlu1 %1341 }
 0x270   : > { %v1340_v56 = vpop.permute.xlu1 %1339 }
 0x2c4   : > { %v920_v36 = vpop.f32.mrb[2].mxu1 }
 0x2c5   : > { %v921_v37 = vadd.f32 %v920_v36, %v846_v35  ;;  %v1915_v38 = vpop.f32.mrb[3].mxu1 }
 0x2c6   : > { %v1522_v38 = vld [vmem:[%s3104_s16 + $0x8] sm:$0xff] }
 0x2c7   : > { %v924_v39 = vsel %vm847_vm2, %v921_v37, -inf }
 0x2c8   : > { %925 = vmax.xlane.f32.xlu0 %v924_v39 }
 0x355   : > { %v926_v40 = vpop.xlane.xlu0 %925 }
 0x356   : > { %v927_v41 = vsub.f32 %v921_v37, %v926_v40  ;;  %v1521_v37 = vld [vmem:[%s3104_s16] sm:$0xff]  ;;  %v1523_v40 = vld [vmem:[%s3104_s16 + $0x10] sm:$0xff] }
 0x357   : > { %v1981_v39 = vpack.c.bf16 %v1522_v38, %v1521_v37 }
 0x358   : > { %v928_v42 = vmul.f32 1.442695, %v927_v41 }
 0x35a   : > { %2105 = vpow2.f32 %v928_v42 }
 0x364   : > { %v2106_v43 = vpop.eup %2105 }
 0x365   : > { %v930_v44 = vsel %vm847_vm2, %v2106_v43, 0.0 }
 0x366   : > { %931 = vadd.xlane.f32.xlu0 %v930_v44 }
 0x37c   : > { %1176 = vrot.lane.b32.xlu0 %v755_v19, %s2449_s27 }
 0x3f3   : > { %v932_v52 = vpop.xlane.xlu0 %931 }
 0x3f4   : > { %2107 = vrcp.f32 %v932_v52 }
 0x3f7   : > { %v1177_v53 = vpop.permute.xlu0 %1176 }
 0x3f8   : > { %1932 = vmatpush3.xpose.msk.msra.mxu0 %vm847_vm2, %v1177_v53  ;;  %v1836_v53 = vld [vmem:[%s3106_s12] ss:$0 sm:$0xff] }
 0x3f9   : > { %1941 = vmatprep.subr.mxu0 %v2447_v1 }
 0x3fb   : > { %1934 = vmatmul.mubr.msk.f32.vlgmr.msra.gmra.mrb[4].mxu0 %vm847_vm2, %v1175_v51 }
 0x3fc   : > { %1942 = vmatpush3.xpose.msk.msra.mxu0 %vm847_vm2, %v1342_v54  ;;  %1943 = vmatprep.mubr.msk.f32.mxu0 %vm2446_vm0, %v2447_v1 }
 0x3fd   : > { %1980 = vmatprep.subr.bf16.mxu0 %v2445_v0 }
 0x3fe   : > { %v2108_v55 = vpop.eup %2107 }
 0x3ff   : > { %v934_v57 = vmul.f32 %v2108_v55, %v2106_v43  ;;  %1944 = vmatmul.mubr.msk.f32.vlgmr.msra.gmra.mrb[6].mxu0 %vm847_vm2, %v1340_v56 }
 0x400   : > { %1959 = vmatprep.mubr.msk.f32.mxu0 %vm2446_vm0, %v2447_v1  ;;  %1982 = vmatpush3.bf16.msra.mxu0 %v1981_v39 }
 0x401   : > { %1919 = vmatmul.mubr.msk.f32.vlgmr.msra.gmra.mrb[4].mxu1 %vm847_vm2, %v934_v57  ;;  %1983 = vmatprep.subr.bf16.mxu0 %v2445_v0 }
 0x402   : > { %1922 = vmatpush3.xpose.msk.msra.mxu1 %vm847_vm2, %v1011_v49  ;;  %1923 = vmatprep.mubr.msk.f32.mxu1 %vm2446_vm0, %v2447_v1 }
 0x403   : > { %1926 = vmatprep.subr.mxu1 %v2447_v1 }
 0x405   : > { %1924 = vmatmul.mubr.msk.f32.vlgmr.msra.gmra.mrb[6].mxu1 %vm847_vm2, %v1009_v50 }
 0x406   : > { %1928 = vmatprep.mubr.msk.f32.mxu1 %vm2446_vm0, %v2447_v1 }
 0x4ce   : > { %v1248_v58 = vpop.f32.mrb[4].mxu0 }
 0x4cf   : > { %v1249_v59 = vadd.f32 %v1248_v58, %v846_v35  ;;  %v1935_v60 = vpop.f32.mrb[5].mxu0 }
 0x4d1   : > { %v1252_v61 = vsel %vm847_vm2, %v1249_v59, -inf }
 0x4d2   : > { %1253 = vmax.xlane.f32.xlu0 %v1252_v61  ;;  %v1413_v62 = vpop.f32.mrb[6].mxu0 }
 0x4d3   : > { %v1945_v63 = vpop.f32.mrb[7].mxu0  ;;  %v1414_v7 = vadd.f32 %v1413_v62, %v846_v35 }
 0x4d4   : > { %v2927_v2 = vpop.f32.mrb[4].mxu1 }
 0x4d5   : > { %v1920_v3 = vpop.f32.mrb[5].mxu1  ;;  %v1417_v9 = vsel %vm847_vm2, %v1414_v7, -inf }
 0x4d8   : > { %v1082_v4 = vpop.f32.mrb[6].mxu1 }
 0x4d9   : > { %v1083_v5 = vadd.f32 %v1082_v4, %v846_v35  ;;  %v1925_v6 = vpop.f32.mrb[7].mxu1 }
 0x4db   : > { %v1086_v8 = vsel %vm847_vm2, %v1083_v5, -inf }
 0x4dc   : > { %1087 = vmax.xlane.f32.xlu1 %v1086_v8 }
 0x4e0   : > { %1418 = vmax.xlane.f32.xlu1 %v1417_v9 }
 0x55f   : > { %v1254_v10 = vpop.xlane.xlu0 %1253 }
 0x560   : > { %v1255_v11 = vsub.f32 %v1249_v59, %v1254_v10 }
 0x562   : > { %v1256_v12 = vmul.f32 1.442695, %v1255_v11 }
 0x564   : > { %2109 = vpow2.f32 %v1256_v12 }
 0x569   : > { %v1088_v13 = vpop.xlane.xlu1 %1087 }
 0x56a   : > { %v1089_v21 = vsub.f32 %v1083_v5, %v1088_v13 }
 0x56c   : > { %v1090_v22 = vmul.f32 1.442695, %v1089_v21 }
 0x56d   : > { %v1419_v14 = vpop.xlane.xlu1 %1418 }
 0x56e   : > { %v2110_v15 = vpop.eup %2109  ;;  %v1420_v16 = vsub.f32 %v1414_v7, %v1419_v14 }
 0x56f   : > { %v1258_v17 = vsel %vm847_vm2, %v2110_v15, 0.0 }
 0x570   : > { %v1421_v18 = vmul.f32 1.442695, %v1420_v16  ;;  %1259 = vadd.xlane.f32.xlu0 %v1258_v17 }
 0x572   : > { %2111 = vpow2.f32 %v1421_v18 }
 0x573   : > { %2113 = vpow2.f32 %v1090_v22 }
 0x57c   : > { %v2112_v19 = vpop.eup %2111 }
 0x57d   : > { %v1423_v20 = vsel %vm847_vm2, %v2112_v19, 0.0  ;;  %v2114_v23 = vpop.eup %2113 }
 0x57e   : > { %1424 = vadd.xlane.f32.xlu1 %v1423_v20  ;;  %v1092_v24 = vsel %vm847_vm2, %v2114_v23, 0.0 }
 0x586   : > { %1098 = vrot.lane.b32.xlu0 %v2903_v47, %s2448_s5  ;;  %s3105_s5 = sld [smem:[#allocation28_spill]] }
 0x58c   : > { %p3108_p8 = scmp.ne.s32.totalorder %s3105_s5, 0 }
 0x58e   : > { %p2353_p5 = pnand %p2352_p6, %p3108_p8 }
 0x58f   : > { %1263 = vrot.lane.b32.xlu1 %v2903_v47, %s2449_s27 }
 0x590   : > { %p2354_p2 = pneg %p2353_p5 }
 0x592   : > { %p2361_p13 = pnand %p2360_p1, %p2354_p2 }
 0x5b3   : > { %1093 = vadd.xlane.f32.xlu1 %v1092_v24 }
 0x5c4   : > { %1428 = vrot.lane.b32.xlu1 %v2903_v47, %s2450_s26 }
 0x5fd   : > { %v1260_v25 = vpop.xlane.xlu0 %1259 }
 0x601   : > { %v1099_v26 = vpop.permute.xlu0 %1098 }
 0x602   : > { %1927 = vmatpush3.msra.mxu1 %v1099_v26 }
 0x603   : > { %1936 = vmatprep.subr.mxu1 %v2447_v1 }
 0x60b   : > { %v1425_v27 = vpop.xlane.xlu1 %1424 }
 0x60f   : > { %v1264_v28 = vpop.permute.xlu1 %1263 }
 0x640   : > { %v1094_v29 = vpop.xlane.xlu1 %1093 }
 0x641   : > { %2115 = vrcp.f32 %v1094_v29 }
 0x642   : > { %2117 = vrcp.f32 %v1260_v25 }
 0x643   : > { %2119 = vrcp.f32 %v1425_v27 }
 0x644   : > { %v1429_v35 = vpop.permute.xlu1 %1428 }
 0x64b   : > { %v2116_v30 = vpop.eup %2115 }
 0x64c   : > { %v1096_v31 = vmul.f32 %v2116_v30, %v2114_v23  ;;  %v2118_v32 = vpop.eup %2117 }
 0x64d   : > { %v1262_v33 = vmul.f32 %v2118_v32, %v2110_v15  ;;  %v2120_v34 = vpop.eup %2119 }
 0x64e   : > { %1929 = vmatmul.mubr.msk.f32.vlgmr.msra.gmra.mrb[8].mxu1 %vm847_vm2, %v1096_v31  ;;  %v1427_v36 = vmul.f32 %v2120_v34, %v2112_v19 }
 0x64f   : > { %1937 = vmatpush3.msra.mxu1 %v1264_v28  ;;  %1938 = vmatprep.mubr.msk.f32.mxu1 %vm2446_vm0, %v2447_v1 }
 0x650   : > { %1946 = vmatprep.subr.mxu1 %v2447_v1 }
 0x652   : > { %1939 = vmatmul.mubr.msk.f32.vlgmr.msra.gmra.mrb[10].mxu1 %vm847_vm2, %v1262_v33 }
 0x653   : > { %1947 = vmatpush3.msra.mxu1 %v1429_v35  ;;  %1948 = vmatprep.mubr.msk.f32.mxu1 %vm2446_vm0, %v2447_v1  ;;  %v1524_v1 = vld [vmem:[%s3104_s16 + $0x18] sm:$0xff] }
 0x654   : > { %v1984_v41 = vpack.c.bf16 %v1524_v1, %v1523_v40 }
 0x656   : > { %1949 = vmatmul.mubr.msk.f32.vlgmr.msra.gmra.mrb[12].mxu1 %vm847_vm2, %v1427_v36  ;;  %1985 = vmatpush3.bf16.msra.mxu0 %v1984_v41 }
 0x721   : > { %v1170_v42 = vpop.f32.mrb[8].mxu1 }
 0x722   : > { %1505 = vrot.lane.b32.xlu0 %v1170_v42, %s2452_s29  ;;  %v1930_v43 = vpop.f32.mrb[9].mxu1 }
 0x725   : > { %v1335_v44 = vpop.f32.mrb[10].mxu1 }
 0x726   : > { %1509 = vrot.lane.b32.xlu1 %v1335_v44, %s2453_s19  ;;  %v1940_v45 = vpop.f32.mrb[11].mxu1 }
 0x729   : > { %v1500_v0 = vpop.f32.mrb[12].mxu1 }
 0x72a   : > { %1513 = vrot.lane.b32.xlu0 %v1500_v0, %s2454_s25  ;;  %v1950_v46 = vpop.f32.mrb[13].mxu1 }
 0x794   : > { %v1506_v47 = vpop.permute.xlu0 %1505 }
 0x795   : > { %v1516_v49 = vsel %vm847_vm2, %v2927_v2, %v1506_v47 }
 0x798   : > { %v1510_v48 = vpop.permute.xlu1 %1509 }
 0x799   : > { %v1518_v50 = vsel %vm1517_vm4, %v1516_v49, %v1510_v48 }
 0x79c   : > { %v1514_v51 = vpop.permute.xlu0 %1513 }
 0x79d   : > { %v1520_v52 = vsel %vm1519_vm5, %v1518_v50, %v1514_v51 }
 0x79e   : > { %1960 = vmatmul.mubr.msk.f32.vlgmr.msra.gmra.mrb[8].mxu0 %vm598_vm1, %v1520_v52 }
 0x871   : > { %v1601_v54 = vpop.f32.mrb[8].mxu0 }
 0x872   : > { %v1602_v55 = vadd.f32 %v1836_v53, %v1601_v54  ;;  %v1961_v56 = vpop.f32.mrb[9].mxu0 }
 0x874   : > { %1605 = vst.msk [vmem:[%s581_s30] sm:$0xff] %vm598_vm1, %v1602_v55 }
 0x875   : > { %2364 = shalt.err (!%p2361_p13)
}
 0x876   : > { %s2365_s14 = scalar_lea.hbm %s2973_s13, 128  ;;  %s2369_s7 = scalar_lea.hbm %s3107_s3, 256 }
 0x877   : > { %p2366_p12 = scmp.ne.s32.totalorder %s2973_s13, %s2365_s14  ;;  %p2370_p9 = scmp.lt.u32.totalorder %s2973_s13, %s3107_s3 }
 0x878   : > { %p2371_p3 = scmp.lt.u32.totalorder %s2369_s7, %s2365_s14  ;;  %p2373_p6 = scmp.lt.u32.totalorder %s2365_s14, %s2973_s13 }
 0x879   : > { %p2367_p0 = pnand %p2366_p12, %p3108_p8 }
 0x87a   : > { %p2372_p11 = por %p2371_p3, %p2370_p9 }
 0x87b   : > { %p2368_p7 = pneg %p2367_p0 }
 0x87c   : > { %p2374_p5 = por %p2373_p6, %p2372_p11 }
 0x87e   : > { %p2375_p2 = pnand %p2374_p5, %p2368_p7 }
 0x880   : > { %2378 = shalt.err (!%p2375_p2)
}
 0x881   : > { %2012 = dma.vmem_to_hbm [thread:$0]  (%p3108_p8), %s2975_s21, 128, %s2973_s13, %s1607_s4  }
 0x882 PF: > { %s3109_s25 = sld [smem:[#allocation23_spill]]  ;;  %s3110_s27 = sld [smem:[#allocation29_spill]] }
 0x883   : > { %s3111_s26 = sld [smem:[#allocation24_spill]] }
 0x888   : > { %s1632_s12 = sand.u32 1, %s3109_s25   ;;  %p3112_p4 = scmp.ne.s32.totalorder %s3110_s27, 0 }
 0x889   : > { %p3113_p10 = scmp.ge.s32.totalorder %s3111_s26, 2  ;;  %s1633_s20 = scalar_lea.sflag [#allocation4], %s1632_s12 }
 0x88b   : > { %p2041_p1 = pnand %p3113_p10, %p3112_p4 }
 0x88d   : > { %2416 = dma.done.wait (!%p2041_p1), %s1633_s20, 128  }
 0x88e   : > { %2418 = vsyncadd (!%p2041_p1), %s1633_s20, 4294967168  ;;  %s3114_s24 = sld [smem:[#allocation26_spill]]  ;;  %s3115_s30 = sld [smem:[#allocation27_spill]] }
 0x88f   : > { %s3116_s21 = smov %s2425_s22  ;;  %s3117_s22 = smov %s2429_s23 }
 0x894   : > { %p31_p13 = scmp.ge.s32.totalorder %s3114_s24, 4   ;;  %s3118_s23 = smov %s3115_s30 }
 0x896   :  { %33 = sbr.rel (!%p31_p13) target bundleno = 19 (0x13), region = 160 }
 0x89d   :  { %1638 = vsyncpa [#allocation3], 1 }
 0x89e   :  { %1640 = vsyncpa [#allocation3 + $0x1], 1 }
 0x89f   :  { %1641 = vsyncpa [#allocation6], 1 }
 0x8a0   :  { %1643 = vsyncpa [#allocation6 + $0x1], 1 }
 0x8a1   :  { %1644 = vsyncpa [#allocation9], 1 }
 0x8a2   :  { %1645 = vsyncpa [#allocation12], 1 }
 0x8a3   :  { %1646 = vsyncpa [#allocation15], 1 }
 0x8a4   :  { %1647 = vsyncpa [#allocation4], 1 }
 0x8a5   :  { %1649 = vsyncpa [#allocation4 + $0x1], 1 }

</bundles_post_ra>
